<compile_context>
chip_gen: v6e
topology: v6e:2x2x1
jax: 0.10.0
libtpu: 0.0.40
codegen_flags: <defaults>
</compile_context>

<pallas_src>
import functools

import jax
import jax.numpy as jnp
import numpy as np
from jax import lax
from jax.experimental import pallas as pl
from jax.experimental.pallas import tpu as pltpu

LANE = 128
SUBLANE = 8


def _round_up(x, m):
    return ((x + m - 1) // m) * m


def _pad_to(x, shape):
    return jnp.pad(x, [(0, s - d) for d, s in zip(x.shape, shape)])


# ---------------------------------------------------------------------------
# Pallas kernel
# ---------------------------------------------------------------------------
def _lstm_attn_kernel(
    x_ref,        # (tT, Bp, Ep) bf16 — current time chunk
    w0x_ref,      # (Ep, 4Hp) bf16 — layer-0 W_ih^T
    w0h_ref,      # (Hp, 4Hp) bf16 — layer-0 W_hh^T
    b0_ref,       # (1, 4Hp) f32
    w1x_ref,      # (Hp, 4Hp) bf16 — layer-1 W_ih^T
    w1h_ref,      # (Hp, 4Hp) bf16 — layer-1 W_hh^T
    b1_ref,       # (1, 4Hp) f32
    attnw_ref,    # (1, Hp) f32
    fcw_ref,      # (Hp, Vp) bf16
    fcb_ref,      # (1, Vp) f32
    out_ref,      # (Bp, Vp) f32
    # --- scratch ---
    gx_ref,       # (tT, Bp, 4Hp) f32 — batched input-projection (reused L0/L1)
    hs0_ref,      # (tT, Bp, Hp) f32  — layer-0 hidden states for the chunk
    h0_ref, c0_ref, h1_ref, c1_ref,   # (Bp, Hp) f32 recurrent state (carried)
    m_ref, l_ref, acc_ref,            # (Bp,1),(Bp,1),(Bp,Hp) f32 online softmax
    *, t_real, needs_mask, unroll,
):
    tT, Bp, Ep = x_ref.shape
    Hp = attnw_ref.shape[1]
    t_blk = pl.program_id(0)

    @pl.when(t_blk == 0)
    def _init():
        z = jnp.zeros((Bp, Hp), jnp.float32)
        h0_ref[...] = z
        c0_ref[...] = z
        h1_ref[...] = z
        c1_ref[...] = z
        m_ref[...] = jnp.full((Bp, 1), -1e30, jnp.float32)
        l_ref[...] = jnp.zeros((Bp, 1), jnp.float32)
        acc_ref[...] = z

    # Grid-invariant operands (constant block index -> no re-DMA per step).
    # TODO(synk): once VMEM headroom matters (real H/V, v7x 64 MiB), drop the
    # double-buffering of these with pipeline_mode=pl.Buffered(1).
    w0h = w0h_ref[...]
    w1h = w1h_ref[...]
    b0 = b0_ref[...]
    b1 = b1_ref[...]
    attnw = attnw_ref[...]

    def gates(g_pre, c):
        # Gate order (i, f, o, g): one wide sigmoid + one tanh per cell.
        sg = jax.nn.sigmoid(g_pre[:, :3 * Hp])
        i = sg[:, 0 * Hp:1 * Hp]
        f = sg[:, 1 * Hp:2 * Hp]
        o = sg[:, 2 * Hp:3 * Hp]
        gg = jnp.tanh(g_pre[:, 3 * Hp:4 * Hp])
        c_new = f * c + i * gg
        h_new = o * jnp.tanh(c_new)
        return h_new, c_new

    # ---- layer 0: batched input projection over the whole time chunk ------
    x_flat = x_ref[...].reshape(tT * Bp, Ep)                       # bf16
    gx_ref[...] = jnp.dot(
        x_flat, w0x_ref[...], preferred_element_type=jnp.float32
    ).reshape(tT, Bp, 4 * Hp)

    def step0(t, carry):
        h, c = carry
        g_pre = (gx_ref[t]
                 + jnp.dot(h.astype(jnp.bfloat16), w0h,
                           preferred_element_type=jnp.float32)
                 + b0)
        h, c = gates(g_pre, c)
        hs0_ref[t] = h
        return (h, c)

    h0, c0 = lax.fori_loop(0, tT, step0, (h0_ref[...], c0_ref[...]),
                           unroll=unroll)
    h0_ref[...] = h0
    c0_ref[...] = c0

    # ---- layer 1: batched input projection of the layer-0 outputs ---------
    hs0_flat = hs0_ref[...].reshape(tT * Bp, Hp).astype(jnp.bfloat16)
    gx_ref[...] = jnp.dot(
        hs0_flat, w1x_ref[...], preferred_element_type=jnp.float32
    ).reshape(tT, Bp, 4 * Hp)

    def step1(t, carry):
        h, c, m, l, acc = carry
        g_pre = (gx_ref[t]
                 + jnp.dot(h.astype(jnp.bfloat16), w1h,
                           preferred_element_type=jnp.float32)
                 + b1)
        h, c = gates(g_pre, c)
        # Online (flash-style) softmax over time.  The attention bias is
        # dropped: a constant shift cancels in softmax.
        s = jnp.sum(h * attnw, axis=-1, keepdims=True)             # (Bp, 1)
        if needs_mask:
            valid = (t_blk * tT + t) < t_real
            m_new = jnp.where(valid, jnp.maximum(m, s), m)
            p = jnp.where(valid, jnp.exp(s - m_new), jnp.zeros_like(s))
        else:
            m_new = jnp.maximum(m, s)
            p = jnp.exp(s - m_new)
        alpha = jnp.exp(m - m_new)
        l = alpha * l + p
        acc = alpha * acc + p * h
        return (h, c, m_new, l, acc)

    h1, c1, m, l, acc = lax.fori_loop(
        0, tT, step1,
        (h1_ref[...], c1_ref[...], m_ref[...], l_ref[...], acc_ref[...]),
        unroll=unroll)
    h1_ref[...] = h1
    c1_ref[...] = c1
    m_ref[...] = m
    l_ref[...] = l
    acc_ref[...] = acc

    @pl.when(t_blk == pl.num_programs(0) - 1)
    def _finalize():
        ctx = acc / l                                  # exact (runs once)
        out_ref[...] = (
            jnp.dot(ctx.astype(jnp.bfloat16), fcw_ref[...],
                    preferred_element_type=jnp.float32)
            + fcb_ref[...]
        )


# ---------------------------------------------------------------------------
# Wrapper
# ---------------------------------------------------------------------------
@functools.partial(jax.jit, static_argnames=("vocab_size", "time_chunk"))
def lstm_attention_forward(x_ids, packed, *, vocab_size, time_chunk=32):
    """Forward pass equivalent to LSTMModelWithAttention.forward.

    x_ids: (B, T) int32 token ids.  Returns logits (B, vocab_size) float32.
    """
    B, T = x_ids.shape
    Ep = packed["emb"].shape[1]
    Hp = packed["attnw"].shape[1]
    Vp = packed["fcw"].shape[1]
    Bp = _round_up(B, SUBLANE)

    # Remainder-safe time chunking: pad T up to a multiple of the chunk and
    # mask padded steps out of the online softmax inside the kernel.
    tT = max(1, min(time_chunk, T))
    T_pad = _round_up(T, tT)
    nT = T_pad // tT
    needs_mask = (T_pad != T)
    unroll = min(4, tT)

    # Embedding gather (plain-JAX glue), produced time-major directly so there
    # is no separate (B,T,E)->(T,B,E) transpose of the activation tensor.
    x_ids_p = jnp.pad(x_ids, ((0, Bp - B), (0, T_pad - T)))
    x = packed["emb"][x_ids_p.T]                        # (T_pad, Bp, Ep) bf16

    kernel = functools.partial(_lstm_attn_kernel,
                               t_real=T, needs_mask=needs_mask, unroll=unroll)

    # TODO(synk): for a real vocab (tens of thousands) tile the fc epilogue
    # over Vp (separate epilogue call or second grid axis) instead of keeping
    # fcw fully resident, and on v7x add a leading 'parallel' batch grid axis
    # so both TensorCores are used.
    out_p = pl.pallas_call(
        kernel,
        out_shape=jax.ShapeDtypeStruct((Bp, Vp), jnp.float32),
        grid_spec=pltpu.PrefetchScalarGridSpec(
            num_scalar_prefetch=0,
            grid=(nT,),
            in_specs=[
                pl.BlockSpec((tT, Bp, Ep), lambda t: (t, 0, 0)),   # x streamed
                pl.BlockSpec((Ep, 4 * Hp), lambda t: (0, 0)),      # W_ih0^T
                pl.BlockSpec((Hp, 4 * Hp), lambda t: (0, 0)),      # W_hh0^T
                pl.BlockSpec((1, 4 * Hp), lambda t: (0, 0)),       # b0
                pl.BlockSpec((Hp, 4 * Hp), lambda t: (0, 0)),      # W_ih1^T
                pl.BlockSpec((Hp, 4 * Hp), lambda t: (0, 0)),      # W_hh1^T
                pl.BlockSpec((1, 4 * Hp), lambda t: (0, 0)),       # b1
                pl.BlockSpec((1, Hp), lambda t: (0, 0)),           # attnw
                pl.BlockSpec((Hp, Vp), lambda t: (0, 0)),          # fcw^T
                pl.BlockSpec((1, Vp), lambda t: (0, 0)),           # fcb
            ],
            out_specs=pl.BlockSpec((Bp, Vp), lambda t: (0, 0)),
            scratch_shapes=[
                pltpu.VMEM((tT, Bp, 4 * Hp), jnp.float32),  # gx (reused L0/L1)
                pltpu.VMEM((tT, Bp, Hp), jnp.float32),      # hs0 chunk
                pltpu.VMEM((Bp, Hp), jnp.float32),          # h0
                pltpu.VMEM((Bp, Hp), jnp.float32),          # c0
                pltpu.VMEM((Bp, Hp), jnp.float32),          # h1
                pltpu.VMEM((Bp, Hp), jnp.float32),          # c1
                pltpu.VMEM((Bp, 1), jnp.float32),           # m
                pltpu.VMEM((Bp, 1), jnp.float32),           # l
                pltpu.VMEM((Bp, Hp), jnp.float32),          # acc
            ],
        ),
        compiler_params=pltpu.CompilerParams(
            dimension_semantics=("arbitrary",)),     # T axis carries state
    )(
        x,
        packed["w0x"], packed["w0h"], packed["b0"],
        packed["w1x"], packed["w1h"], packed["b1"],
        packed["attnw"], packed["fcw"], packed["fcb"],
    )
    return out_p[:B, :vocab_size]


# ---------------------------------------------------------------------------
# Parameter init (torch layout) + packing into kernel layout
# ---------------------------------------------------------------------------
def init_params(key, vocab_size, embedding_dim, hidden_dim):
    E, H, V = embedding_dim, hidden_dim, vocab_size
    ks = jax.random.split(key, 13)
    k_lstm = 1.0 / np.sqrt(H)

    def unif(k, shape, bound):
        return jax.random.uniform(k, shape, jnp.float32, -bound, bound)

    emb = jax.random.normal(ks[0], (V, E), jnp.float32)     # nn.Embedding N(0,1)
    wih0 = unif(ks[1], (4 * H, E), k_lstm)
    whh0 = unif(ks[2], (4 * H, H), k_lstm)
    bih0 = unif(ks[3], (4 * H,), k_lstm)
    bhh0 = unif(ks[4], (4 * H,), k_lstm)
    wih1 = unif(ks[5], (4 * H, H), k_lstm)
    whh1 = unif(ks[6], (4 * H, H), k_lstm)
    bih1 = unif(ks[7], (4 * H,), k_lstm)
    bhh1 = unif(ks[8], (4 * H,), k_lstm)
    attn_w = unif(ks[9], (1, H), k_lstm)
    attn_b = unif(ks[10], (1,), k_lstm)
    fc_w = unif(ks[11], (V, H), k_lstm)
    fc_b = unif(ks[12], (V,), k_lstm)

    return dict(embedding=emb,
                wih0=wih0, whh0=whh0, bih0=bih0, bhh0=bhh0,
                wih1=wih1, whh1=whh1, bih1=bih1, bhh1=bhh1,
                attn_w=attn_w, attn_b=attn_b, fc_w=fc_w, fc_b=fc_b)


def pack_params(raw):
    """Pad / transpose / reorder raw torch-layout params into kernel layout."""
    E = raw["wih0"].shape[1]
    H = raw["whh0"].shape[1]
    V = raw["fc_w"].shape[0]
    Ep, Hp, Vp = _round_up(E, LANE), _round_up(H, LANE), _round_up(V, LANE)
    GATE_ORDER = (0, 1, 3, 2)   # torch (i,f,g,o) -> kernel (i,f,o,g)

    def pack_w(w, in_pad):
        wt = w.T                                    # (in, 4H)
        blocks = [_pad_to(wt[:, g * H:(g + 1) * H], (in_pad, Hp))
                  for g in GATE_ORDER]
        return jnp.concatenate(blocks, axis=1).astype(jnp.bfloat16)

    def pack_b(bih, bhh):
        b = bih + bhh                               # (4H,)
        blocks = [_pad_to(b[g * H:(g + 1) * H], (Hp,)) for g in GATE_ORDER]
        return jnp.concatenate(blocks)[None, :].astype(jnp.float32)

    emb = _pad_to(raw["embedding"],
                  (raw["embedding"].shape[0], Ep)).astype(jnp.bfloat16)
    attnw = _pad_to(raw["attn_w"], (1, Hp)).astype(jnp.float32)
    # attn_b is intentionally dropped: softmax is invariant to a constant shift.
    fcw = _pad_to(raw["fc_w"].T, (Hp, Vp)).astype(jnp.bfloat16)
    fcb = _pad_to(raw["fc_b"][None, :], (1, Vp)).astype(jnp.float32)

    return dict(
        emb=emb,
        w0x=pack_w(raw["wih0"], Ep), w0h=pack_w(raw["whh0"], Hp),
        b0=pack_b(raw["bih0"], raw["bhh0"]),
        w1x=pack_w(raw["wih1"], Hp), w1h=pack_w(raw["whh1"], Hp),
        b1=pack_b(raw["bih1"], raw["bhh1"]),
        attnw=attnw, fcw=fcw, fcb=fcb)


# ---------------------------------------------------------------------------
# Pure-JAX f32 reference (mirrors the torch forward)
# ---------------------------------------------------------------------------
def reference_forward(x_ids, raw):
    emb = raw["embedding"][x_ids]                    # (B, T, E)
    B, T, E = emb.shape
    H = raw["whh0"].shape[1]

    def run_layer(xs, wih, whh, bih, bhh):
        def step(carry, x_t):
            h, c = carry
            g = x_t @ wih.T + bih + h @ whh.T + bhh
            i = jax.nn.sigmoid(g[:, 0 * H:1 * H])
            f = jax.nn.sigmoid(g[:, 1 * H:2 * H])
            gg = jnp.tanh(g[:, 2 * H:3 * H])
            o = jax.nn.sigmoid(g[:, 3 * H:4 * H])
            c = f * c + i * gg
            h = o * jnp.tanh(c)
            return (h, c), h

        xs_t = jnp.swapaxes(xs, 0, 1)
        z = jnp.zeros((B, H), jnp.float32)
        (_, _), hs = lax.scan(step, (z, z), xs_t)
        return jnp.swapaxes(hs, 0, 1)                # (B, T, H)

    h0 = run_layer(emb, raw["wih0"], raw["whh0"], raw["bih0"], raw["bhh0"])
    h1 = run_layer(h0, raw["wih1"], raw["whh1"], raw["bih1"], raw["bhh1"])

    scores = jax.nn.softmax(
        (h1 @ raw["attn_w"].T + raw["attn_b"])[..., 0], axis=1)   # (B, T)
    ctx = jnp.einsum("bt,bth->bh", scores, h1)
    return ctx @ raw["fc_w"].T + raw["fc_b"]


# ---------------------------------------------------------------------------
if __name__ == "__main__":
    vocab_size = 32          # len(vocab) + 1 == 32
    embedding_dim = 16
    hidden_dim = 32
    batch = 2
    seq_len = 10             # not a multiple of the chunk -> exercises masking

    key = jax.random.PRNGKey(0)
    k_params, k_data = jax.random.split(key)
    raw = init_params(k_params, vocab_size, embedding_dim, hidden_dim)
    packed = pack_params(raw)

    x_ids = jax.random.randint(k_data, (batch, seq_len), 0, vocab_size,
                               dtype=jnp.int32)

    # time_chunk=4 with T=10 -> 3 grid steps, last chunk has 2 masked padded
    # steps: exercises streamed T, cross-step state carry and the mask path.
    out = lstm_attention_forward(x_ids, packed, vocab_size=vocab_size,
                                 time_chunk=4)
    out = jax.block_until_ready(out)

    ref = jax.block_until_ready(reference_forward(x_ids, raw))
    # bf16 MXU operands (f32 accumulation/state) -> looser tolerance vs the
    # all-f32 reference.
    np.testing.assert_allclose(np.asarray(out), np.asarray(ref),
                               rtol=5e-2, atol=5e-2)

    assert out.shape == (batch, vocab_size) and out.dtype == jnp.float32
    print("KERNEL_OK")
</pallas_src>

<mosaic_0001>
module attributes {stable_mosaic.version = 11 : i64} {
  func.func @_lstm_attn_kernel(%arg0: i32, %arg1: memref<4x8x128xbf16, #tpu.memory_space<vmem>>, %arg2: memref<128x512xbf16, #tpu.memory_space<vmem>>, %arg3: memref<128x512xbf16, #tpu.memory_space<vmem>>, %arg4: memref<1x512xf32, #tpu.memory_space<vmem>>, %arg5: memref<128x512xbf16, #tpu.memory_space<vmem>>, %arg6: memref<128x512xbf16, #tpu.memory_space<vmem>>, %arg7: memref<1x512xf32, #tpu.memory_space<vmem>>, %arg8: memref<1x128xf32, #tpu.memory_space<vmem>>, %arg9: memref<128x128xbf16, #tpu.memory_space<vmem>>, %arg10: memref<1x128xf32, #tpu.memory_space<vmem>>, %arg11: memref<8x128xf32, #tpu.memory_space<vmem>>, %arg12: memref<4x8x512xf32, #tpu.memory_space<vmem>>, %arg13: memref<4x8x128xf32, #tpu.memory_space<vmem>>, %arg14: memref<8x128xf32, #tpu.memory_space<vmem>>, %arg15: memref<8x128xf32, #tpu.memory_space<vmem>>, %arg16: memref<8x128xf32, #tpu.memory_space<vmem>>, %arg17: memref<8x128xf32, #tpu.memory_space<vmem>>, %arg18: memref<8x1xf32, #tpu.memory_space<vmem>>, %arg19: memref<8x1xf32, #tpu.memory_space<vmem>>, %arg20: memref<8x128xf32, #tpu.memory_space<vmem>>) attributes {dimension_semantics = [#tpu.dimension_semantics<arbitrary>], iteration_bounds = array<i64: 3>, scalar_prefetch = 0 : i64, scratch_operands = 9 : i64, tpu.core_type = #tpu.core_type<tc>, window_params = [{transform_indices = @transform_0, window_bounds = array<i64: 4, 8, 128>}, {pipeline_mode = #tpu.pipeline_mode<synchronous>, transform_indices = @transform_1, window_bounds = array<i64: 128, 512>}, {pipeline_mode = #tpu.pipeline_mode<synchronous>, transform_indices = @transform_2, window_bounds = array<i64: 128, 512>}, {pipeline_mode = #tpu.pipeline_mode<synchronous>, transform_indices = @transform_3, window_bounds = array<i64: 1, 512>}, {pipeline_mode = #tpu.pipeline_mode<synchronous>, transform_indices = @transform_4, window_bounds = array<i64: 128, 512>}, {pipeline_mode = #tpu.pipeline_mode<synchronous>, transform_indices = @transform_5, window_bounds = array<i64: 128, 512>}, {pipeline_mode = #tpu.pipeline_mode<synchronous>, transform_indices = @transform_6, window_bounds = array<i64: 1, 512>}, {pipeline_mode = #tpu.pipeline_mode<synchronous>, transform_indices = @transform_7, window_bounds = array<i64: 1, 128>}, {pipeline_mode = #tpu.pipeline_mode<synchronous>, transform_indices = @transform_8, window_bounds = array<i64: 128, 128>}, {pipeline_mode = #tpu.pipeline_mode<synchronous>, transform_indices = @transform_9, window_bounds = array<i64: 1, 128>}, {pipeline_mode = #tpu.pipeline_mode<synchronous>, transform_indices = @transform_10, window_bounds = array<i64: 8, 128>}]} {
    %c0_i32 = arith.constant 0 : i32
    %0 = arith.cmpi eq, %arg0, %c0_i32 : i32
    %1 = arith.extui %0 : i1 to i32
    %c0_i32_0 = arith.constant 0 : i32
    %2 = arith.cmpi ne, %1, %c0_i32_0 : i32
    scf.if %2 {
      %cst_118 = arith.constant 0.000000e+00 : f32
      %334 = vector.broadcast %cst_118 : f32 to vector<8x128xf32>
      %c0_119 = arith.constant 0 : index
      %c0_120 = arith.constant 0 : index
      %335 = vector.load %arg14[%c0_119, %c0_120] : memref<8x128xf32, #tpu.memory_space<vmem>>, vector<8x128xf32>
      tpu.vector_store %arg14[%c0_119, %c0_120], %334 {strides = array<i32>} : memref<8x128xf32, #tpu.memory_space<vmem>>, vector<8x128xf32>,
      %c0_121 = arith.constant 0 : index
      %c0_122 = arith.constant 0 : index
      %336 = vector.load %arg15[%c0_121, %c0_122] : memref<8x128xf32, #tpu.memory_space<vmem>>, vector<8x128xf32>
      tpu.vector_store %arg15[%c0_121, %c0_122], %334 {strides = array<i32>} : memref<8x128xf32, #tpu.memory_space<vmem>>, vector<8x128xf32>,
      %c0_123 = arith.constant 0 : index
      %c0_124 = arith.constant 0 : index
      %337 = vector.load %arg16[%c0_123, %c0_124] : memref<8x128xf32, #tpu.memory_space<vmem>>, vector<8x128xf32>
      tpu.vector_store %arg16[%c0_123, %c0_124], %334 {strides = array<i32>} : memref<8x128xf32, #tpu.memory_space<vmem>>, vector<8x128xf32>,
      %c0_125 = arith.constant 0 : index
      %c0_126 = arith.constant 0 : index
      %338 = vector.load %arg17[%c0_125, %c0_126] : memref<8x128xf32, #tpu.memory_space<vmem>>, vector<8x128xf32>
      tpu.vector_store %arg17[%c0_125, %c0_126], %334 {strides = array<i32>} : memref<8x128xf32, #tpu.memory_space<vmem>>, vector<8x128xf32>,
      %cst_127 = arith.constant -1.000000e+30 : f32
      %339 = vector.broadcast %cst_127 : f32 to vector<8x1xf32>
      %c0_128 = arith.constant 0 : index
      %c0_129 = arith.constant 0 : index
      %340 = vector.load %arg18[%c0_128, %c0_129] : memref<8x1xf32, #tpu.memory_space<vmem>>, vector<8x1xf32>
      tpu.vector_store %arg18[%c0_128, %c0_129], %339 {strides = array<i32>} : memref<8x1xf32, #tpu.memory_space<vmem>>, vector<8x1xf32>,
      %cst_130 = arith.constant 0.000000e+00 : f32
      %341 = vector.broadcast %cst_130 : f32 to vector<8x1xf32>
      %c0_131 = arith.constant 0 : index
      %c0_132 = arith.constant 0 : index
      %342 = vector.load %arg19[%c0_131, %c0_132] : memref<8x1xf32, #tpu.memory_space<vmem>>, vector<8x1xf32>
      tpu.vector_store %arg19[%c0_131, %c0_132], %341 {strides = array<i32>} : memref<8x1xf32, #tpu.memory_space<vmem>>, vector<8x1xf32>,
      %c0_133 = arith.constant 0 : index
      %c0_134 = arith.constant 0 : index
      %343 = vector.load %arg20[%c0_133, %c0_134] : memref<8x128xf32, #tpu.memory_space<vmem>>, vector<8x128xf32>
      tpu.vector_store %arg20[%c0_133, %c0_134], %334 {strides = array<i32>} : memref<8x128xf32, #tpu.memory_space<vmem>>, vector<8x128xf32>,
    } else {
    }
    %c0 = arith.constant 0 : index
    %c0_1 = arith.constant 0 : index
    %3 = vector.load %arg3[%c0, %c0_1] : memref<128x512xbf16, #tpu.memory_space<vmem>>, vector<128x512xbf16>
    %c0_2 = arith.constant 0 : index
    %c0_3 = arith.constant 0 : index
    %4 = vector.load %arg6[%c0_2, %c0_3] : memref<128x512xbf16, #tpu.memory_space<vmem>>, vector<128x512xbf16>
    %c0_4 = arith.constant 0 : index
    %c0_5 = arith.constant 0 : index
    %5 = vector.load %arg4[%c0_4, %c0_5] : memref<1x512xf32, #tpu.memory_space<vmem>>, vector<1x512xf32>
    %c0_6 = arith.constant 0 : index
    %c0_7 = arith.constant 0 : index
    %6 = vector.load %arg7[%c0_6, %c0_7] : memref<1x512xf32, #tpu.memory_space<vmem>>, vector<1x512xf32>
    %c0_8 = arith.constant 0 : index
    %c0_9 = arith.constant 0 : index
    %7 = vector.load %arg8[%c0_8, %c0_9] : memref<1x128xf32, #tpu.memory_space<vmem>>, vector<1x128xf32>
    %c0_10 = arith.constant 0 : index
    %c0_11 = arith.constant 0 : index
    %c0_12 = arith.constant 0 : index
    %8 = vector.load %arg1[%c0_10, %c0_11, %c0_12] : memref<4x8x128xbf16, #tpu.memory_space<vmem>>, vector<4x8x128xbf16>
    %9 = vector.shape_cast %8 : vector<4x8x128xbf16> to vector<32x128xbf16>
    %c0_13 = arith.constant 0 : index
    %c0_14 = arith.constant 0 : index
    %10 = vector.load %arg2[%c0_13, %c0_14] : memref<128x512xbf16, #tpu.memory_space<vmem>>, vector<128x512xbf16>
    %cst = arith.constant dense<0.000000e+00> : vector<32x512xf32>
    %11 = tpu.matmul %9, %10, %cst {dimension_numbers = #tpu.dot_dimension_numbers<[1], [0], [0], [1], [0, 0, 1, 1], [], []>} : vector<32x128xbf16>, vector<128x512xbf16>, vector<32x512xf32> -> vector<32x512xf32>
    %12 = vector.shape_cast %11 : vector<32x512xf32> to vector<4x8x512xf32>
    %c0_15 = arith.constant 0 : index
    %c0_16 = arith.constant 0 : index
    %c0_17 = arith.constant 0 : index
    %13 = vector.load %arg12[%c0_15, %c0_16, %c0_17] : memref<4x8x512xf32, #tpu.memory_space<vmem>>, vector<4x8x512xf32>
    tpu.vector_store %arg12[%c0_15, %c0_16, %c0_17], %12 {strides = array<i32>} : memref<4x8x512xf32, #tpu.memory_space<vmem>>, vector<4x8x512xf32>,
    %c0_18 = arith.constant 0 : index
    %c0_19 = arith.constant 0 : index
    %14 = vector.load %arg14[%c0_18, %c0_19] : memref<8x128xf32, #tpu.memory_space<vmem>>, vector<8x128xf32>
    %c0_20 = arith.constant 0 : index
    %c0_21 = arith.constant 0 : index
    %15 = vector.load %arg15[%c0_20, %c0_21] : memref<8x128xf32, #tpu.memory_space<vmem>>, vector<8x128xf32>
    %c0_i32_22 = arith.constant 0 : i32
    %16 = arith.index_cast %c0_i32_22 : i32 to index
    %c0_23 = arith.constant 0 : index
    %c0_24 = arith.constant 0 : index
    %17 = vector.load %arg12[%16, %c0_23, %c0_24] : memref<4x8x512xf32, #tpu.memory_space<vmem>>, vector<1x8x512xf32>
    %18 = vector.shape_cast %17 : vector<1x8x512xf32> to vector<8x512xf32>
    %19 = arith.truncf %14 : vector<8x128xf32> to vector<8x128xbf16>
    %cst_25 = arith.constant dense<0.000000e+00> : vector<8x512xf32>
    %20 = tpu.matmul %19, %3, %cst_25 {dimension_numbers = #tpu.dot_dimension_numbers<[1], [0], [0], [1], [0, 0, 1, 1], [], []>} : vector<8x128xbf16>, vector<128x512xbf16>, vector<8x512xf32> -> vector<8x512xf32>
    %21 = arith.addf %18, %20 : vector<8x512xf32>
    %22 = vector.broadcast %5 : vector<1x512xf32> to vector<8x512xf32>
    %23 = arith.addf %21, %22 : vector<8x512xf32>
    %24 = vector.extract_strided_slice %23 {offsets = [0, 0], sizes = [8, 384], strides = [1, 1]} : vector<8x512xf32> to vector<8x384xf32>
    %25 = arith.negf %24 : vector<8x384xf32>
    %26 = math.exp %25 : vector<8x384xf32>
    %cst_26 = arith.constant 1.000000e+00 : f32
    %27 = vector.broadcast %cst_26 : f32 to vector<8x384xf32>
    %28 = arith.addf %27, %26 : vector<8x384xf32>
    %29 = arith.divf %27, %28 : vector<8x384xf32>
    %30 = vector.extract_strided_slice %29 {offsets = [0, 0], sizes = [8, 128], strides = [1, 1]} : vector<8x384xf32> to vector<8x128xf32>
    %31 = vector.extract_strided_slice %29 {offsets = [0, 128], sizes = [8, 128], strides = [1, 1]} : vector<8x384xf32> to vector<8x128xf32>
    %32 = vector.extract_strided_slice %29 {offsets = [0, 256], sizes = [8, 128], strides = [1, 1]} : vector<8x384xf32> to vector<8x128xf32>
    %33 = vector.extract_strided_slice %23 {offsets = [0, 384], sizes = [8, 128], strides = [1, 1]} : vector<8x512xf32> to vector<8x128xf32>
    %34 = math.tanh %33 : vector<8x128xf32>
    %35 = arith.mulf %31, %15 : vector<8x128xf32>
    %36 = arith.mulf %30, %34 : vector<8x128xf32>
    %37 = arith.addf %35, %36 : vector<8x128xf32>
    %38 = math.tanh %37 : vector<8x128xf32>
    %39 = arith.mulf %32, %38 : vector<8x128xf32>
    %40 = arith.index_cast %c0_i32_22 : i32 to index
    %c0_27 = arith.constant 0 : index
    %c0_28 = arith.constant 0 : index
    %41 = vector.load %arg13[%40, %c0_27, %c0_28] : memref<4x8x128xf32, #tpu.memory_space<vmem>>, vector<1x8x128xf32>
    %42 = vector.shape_cast %41 : vector<1x8x128xf32> to vector<8x128xf32>
    %43 = vector.shape_cast %39 : vector<8x128xf32> to vector<1x8x128xf32>
    tpu.vector_store %arg13[%40, %c0_27, %c0_28], %43 {strides = array<i32>} : memref<4x8x128xf32, #tpu.memory_space<vmem>>, vector<1x8x128xf32>,
    %c1_i32 = arith.constant 1 : i32
    %44 = arith.index_cast %c1_i32 : i32 to index
    %c0_29 = arith.constant 0 : index
    %c0_30 = arith.constant 0 : index
    %45 = vector.load %arg12[%44, %c0_29, %c0_30] : memref<4x8x512xf32, #tpu.memory_space<vmem>>, vector<1x8x512xf32>
    %46 = vector.shape_cast %45 : vector<1x8x512xf32> to vector<8x512xf32>
    %47 = arith.truncf %39 : vector<8x128xf32> to vector<8x128xbf16>
    %cst_31 = arith.constant dense<0.000000e+00> : vector<8x512xf32>
    %48 = tpu.matmul %47, %3, %cst_31 {dimension_numbers = #tpu.dot_dimension_numbers<[1], [0], [0], [1], [0, 0, 1, 1], [], []>} : vector<8x128xbf16>, vector<128x512xbf16>, vector<8x512xf32> -> vector<8x512xf32>
    %49 = arith.addf %46, %48 : vector<8x512xf32>
    %50 = vector.broadcast %5 : vector<1x512xf32> to vector<8x512xf32>
    %51 = arith.addf %49, %50 : vector<8x512xf32>
    %52 = vector.extract_strided_slice %51 {offsets = [0, 0], sizes = [8, 384], strides = [1, 1]} : vector<8x512xf32> to vector<8x384xf32>
    %53 = arith.negf %52 : vector<8x384xf32>
    %54 = math.exp %53 : vector<8x384xf32>
    %cst_32 = arith.constant 1.000000e+00 : f32
    %55 = vector.broadcast %cst_32 : f32 to vector<8x384xf32>
    %56 = arith.addf %55, %54 : vector<8x384xf32>
    %57 = arith.divf %55, %56 : vector<8x384xf32>
    %58 = vector.extract_strided_slice %57 {offsets = [0, 0], sizes = [8, 128], strides = [1, 1]} : vector<8x384xf32> to vector<8x128xf32>
    %59 = vector.extract_strided_slice %57 {offsets = [0, 128], sizes = [8, 128], strides = [1, 1]} : vector<8x384xf32> to vector<8x128xf32>
    %60 = vector.extract_strided_slice %57 {offsets = [0, 256], sizes = [8, 128], strides = [1, 1]} : vector<8x384xf32> to vector<8x128xf32>
    %61 = vector.extract_strided_slice %51 {offsets = [0, 384], sizes = [8, 128], strides = [1, 1]} : vector<8x512xf32> to vector<8x128xf32>
    %62 = math.tanh %61 : vector<8x128xf32>
    %63 = arith.mulf %59, %37 : vector<8x128xf32>
    %64 = arith.mulf %58, %62 : vector<8x128xf32>
    %65 = arith.addf %63, %64 : vector<8x128xf32>
    %66 = math.tanh %65 : vector<8x128xf32>
    %67 = arith.mulf %60, %66 : vector<8x128xf32>
    %68 = arith.index_cast %c1_i32 : i32 to index
    %c0_33 = arith.constant 0 : index
    %c0_34 = arith.constant 0 : index
    %69 = vector.load %arg13[%68, %c0_33, %c0_34] : memref<4x8x128xf32, #tpu.memory_space<vmem>>, vector<1x8x128xf32>
    %70 = vector.shape_cast %69 : vector<1x8x128xf32> to vector<8x128xf32>
    %71 = vector.shape_cast %67 : vector<8x128xf32> to vector<1x8x128xf32>
    tpu.vector_store %arg13[%68, %c0_33, %c0_34], %71 {strides = array<i32>} : memref<4x8x128xf32, #tpu.memory_space<vmem>>, vector<1x8x128xf32>,
    %c2_i32 = arith.constant 2 : i32
    %72 = arith.index_cast %c2_i32 : i32 to index
    %c0_35 = arith.constant 0 : index
    %c0_36 = arith.constant 0 : index
    %73 = vector.load %arg12[%72, %c0_35, %c0_36] : memref<4x8x512xf32, #tpu.memory_space<vmem>>, vector<1x8x512xf32>
    %74 = vector.shape_cast %73 : vector<1x8x512xf32> to vector<8x512xf32>
    %75 = arith.truncf %67 : vector<8x128xf32> to vector<8x128xbf16>
    %cst_37 = arith.constant dense<0.000000e+00> : vector<8x512xf32>
    %76 = tpu.matmul %75, %3, %cst_37 {dimension_numbers = #tpu.dot_dimension_numbers<[1], [0], [0], [1], [0, 0, 1, 1], [], []>} : vector<8x128xbf16>, vector<128x512xbf16>, vector<8x512xf32> -> vector<8x512xf32>
    %77 = arith.addf %74, %76 : vector<8x512xf32>
    %78 = vector.broadcast %5 : vector<1x512xf32> to vector<8x512xf32>
    %79 = arith.addf %77, %78 : vector<8x512xf32>
    %80 = vector.extract_strided_slice %79 {offsets = [0, 0], sizes = [8, 384], strides = [1, 1]} : vector<8x512xf32> to vector<8x384xf32>
    %81 = arith.negf %80 : vector<8x384xf32>
    %82 = math.exp %81 : vector<8x384xf32>
    %cst_38 = arith.constant 1.000000e+00 : f32
    %83 = vector.broadcast %cst_38 : f32 to vector<8x384xf32>
    %84 = arith.addf %83, %82 : vector<8x384xf32>
    %85 = arith.divf %83, %84 : vector<8x384xf32>
    %86 = vector.extract_strided_slice %85 {offsets = [0, 0], sizes = [8, 128], strides = [1, 1]} : vector<8x384xf32> to vector<8x128xf32>
    %87 = vector.extract_strided_slice %85 {offsets = [0, 128], sizes = [8, 128], strides = [1, 1]} : vector<8x384xf32> to vector<8x128xf32>
    %88 = vector.extract_strided_slice %85 {offsets = [0, 256], sizes = [8, 128], strides = [1, 1]} : vector<8x384xf32> to vector<8x128xf32>
    %89 = vector.extract_strided_slice %79 {offsets = [0, 384], sizes = [8, 128], strides = [1, 1]} : vector<8x512xf32> to vector<8x128xf32>
    %90 = math.tanh %89 : vector<8x128xf32>
    %91 = arith.mulf %87, %65 : vector<8x128xf32>
    %92 = arith.mulf %86, %90 : vector<8x128xf32>
    %93 = arith.addf %91, %92 : vector<8x128xf32>
    %94 = math.tanh %93 : vector<8x128xf32>
    %95 = arith.mulf %88, %94 : vector<8x128xf32>
    %96 = arith.index_cast %c2_i32 : i32 to index
    %c0_39 = arith.constant 0 : index
    %c0_40 = arith.constant 0 : index
    %97 = vector.load %arg13[%96, %c0_39, %c0_40] : memref<4x8x128xf32, #tpu.memory_space<vmem>>, vector<1x8x128xf32>
    %98 = vector.shape_cast %97 : vector<1x8x128xf32> to vector<8x128xf32>
    %99 = vector.shape_cast %95 : vector<8x128xf32> to vector<1x8x128xf32>
    tpu.vector_store %arg13[%96, %c0_39, %c0_40], %99 {strides = array<i32>} : memref<4x8x128xf32, #tpu.memory_space<vmem>>, vector<1x8x128xf32>,
    %c3_i32 = arith.constant 3 : i32
    %100 = arith.index_cast %c3_i32 : i32 to index
    %c0_41 = arith.constant 0 : index
    %c0_42 = arith.constant 0 : index
    %101 = vector.load %arg12[%100, %c0_41, %c0_42] : memref<4x8x512xf32, #tpu.memory_space<vmem>>, vector<1x8x512xf32>
    %102 = vector.shape_cast %101 : vector<1x8x512xf32> to vector<8x512xf32>
    %103 = arith.truncf %95 : vector<8x128xf32> to vector<8x128xbf16>
    %cst_43 = arith.constant dense<0.000000e+00> : vector<8x512xf32>
    %104 = tpu.matmul %103, %3, %cst_43 {dimension_numbers = #tpu.dot_dimension_numbers<[1], [0], [0], [1], [0, 0, 1, 1], [], []>} : vector<8x128xbf16>, vector<128x512xbf16>, vector<8x512xf32> -> vector<8x512xf32>
    %105 = arith.addf %102, %104 : vector<8x512xf32>
    %106 = vector.broadcast %5 : vector<1x512xf32> to vector<8x512xf32>
    %107 = arith.addf %105, %106 : vector<8x512xf32>
    %108 = vector.extract_strided_slice %107 {offsets = [0, 0], sizes = [8, 384], strides = [1, 1]} : vector<8x512xf32> to vector<8x384xf32>
    %109 = arith.negf %108 : vector<8x384xf32>
    %110 = math.exp %109 : vector<8x384xf32>
    %cst_44 = arith.constant 1.000000e+00 : f32
    %111 = vector.broadcast %cst_44 : f32 to vector<8x384xf32>
    %112 = arith.addf %111, %110 : vector<8x384xf32>
    %113 = arith.divf %111, %112 : vector<8x384xf32>
    %114 = vector.extract_strided_slice %113 {offsets = [0, 0], sizes = [8, 128], strides = [1, 1]} : vector<8x384xf32> to vector<8x128xf32>
    %115 = vector.extract_strided_slice %113 {offsets = [0, 128], sizes = [8, 128], strides = [1, 1]} : vector<8x384xf32> to vector<8x128xf32>
    %116 = vector.extract_strided_slice %113 {offsets = [0, 256], sizes = [8, 128], strides = [1, 1]} : vector<8x384xf32> to vector<8x128xf32>
    %117 = vector.extract_strided_slice %107 {offsets = [0, 384], sizes = [8, 128], strides = [1, 1]} : vector<8x512xf32> to vector<8x128xf32>
    %118 = math.tanh %117 : vector<8x128xf32>
    %119 = arith.mulf %115, %93 : vector<8x128xf32>
    %120 = arith.mulf %114, %118 : vector<8x128xf32>
    %121 = arith.addf %119, %120 : vector<8x128xf32>
    %122 = math.tanh %121 : vector<8x128xf32>
    %123 = arith.mulf %116, %122 : vector<8x128xf32>
    %124 = arith.index_cast %c3_i32 : i32 to index
    %c0_45 = arith.constant 0 : index
    %c0_46 = arith.constant 0 : index
    %125 = vector.load %arg13[%124, %c0_45, %c0_46] : memref<4x8x128xf32, #tpu.memory_space<vmem>>, vector<1x8x128xf32>
    %126 = vector.shape_cast %125 : vector<1x8x128xf32> to vector<8x128xf32>
    %127 = vector.shape_cast %123 : vector<8x128xf32> to vector<1x8x128xf32>
    tpu.vector_store %arg13[%124, %c0_45, %c0_46], %127 {strides = array<i32>} : memref<4x8x128xf32, #tpu.memory_space<vmem>>, vector<1x8x128xf32>,
    %c4_i32 = arith.constant 4 : i32
    %c0_47 = arith.constant 0 : index
    %c0_48 = arith.constant 0 : index
    %128 = vector.load %arg14[%c0_47, %c0_48] : memref<8x128xf32, #tpu.memory_space<vmem>>, vector<8x128xf32>
    tpu.vector_store %arg14[%c0_47, %c0_48], %123 {strides = array<i32>} : memref<8x128xf32, #tpu.memory_space<vmem>>, vector<8x128xf32>,
    %c0_49 = arith.constant 0 : index
    %c0_50 = arith.constant 0 : index
    %129 = vector.load %arg15[%c0_49, %c0_50] : memref<8x128xf32, #tpu.memory_space<vmem>>, vector<8x128xf32>
    tpu.vector_store %arg15[%c0_49, %c0_50], %121 {strides = array<i32>} : memref<8x128xf32, #tpu.memory_space<vmem>>, vector<8x128xf32>,
    %c0_51 = arith.constant 0 : index
    %c0_52 = arith.constant 0 : index
    %c0_53 = arith.constant 0 : index
    %130 = vector.load %arg13[%c0_51, %c0_52, %c0_53] : memref<4x8x128xf32, #tpu.memory_space<vmem>>, vector<4x8x128xf32>
    %131 = vector.shape_cast %130 : vector<4x8x128xf32> to vector<32x128xf32>
    %132 = arith.truncf %131 : vector<32x128xf32> to vector<32x128xbf16>
    %c0_54 = arith.constant 0 : index
    %c0_55 = arith.constant 0 : index
    %133 = vector.load %arg5[%c0_54, %c0_55] : memref<128x512xbf16, #tpu.memory_space<vmem>>, vector<128x512xbf16>
    %cst_56 = arith.constant dense<0.000000e+00> : vector<32x512xf32>
    %134 = tpu.matmul %132, %133, %cst_56 {dimension_numbers = #tpu.dot_dimension_numbers<[1], [0], [0], [1], [0, 0, 1, 1], [], []>} : vector<32x128xbf16>, vector<128x512xbf16>, vector<32x512xf32> -> vector<32x512xf32>
    %135 = vector.shape_cast %134 : vector<32x512xf32> to vector<4x8x512xf32>
    %c0_57 = arith.constant 0 : index
    %c0_58 = arith.constant 0 : index
    %c0_59 = arith.constant 0 : index
    %136 = vector.load %arg12[%c0_57, %c0_58, %c0_59] : memref<4x8x512xf32, #tpu.memory_space<vmem>>, vector<4x8x512xf32>
    tpu.vector_store %arg12[%c0_57, %c0_58, %c0_59], %135 {strides = array<i32>} : memref<4x8x512xf32, #tpu.memory_space<vmem>>, vector<4x8x512xf32>,
    %c0_60 = arith.constant 0 : index
    %c0_61 = arith.constant 0 : index
    %137 = vector.load %arg16[%c0_60, %c0_61] : memref<8x128xf32, #tpu.memory_space<vmem>>, vector<8x128xf32>
    %c0_62 = arith.constant 0 : index
    %c0_63 = arith.constant 0 : index
    %138 = vector.load %arg17[%c0_62, %c0_63] : memref<8x128xf32, #tpu.memory_space<vmem>>, vector<8x128xf32>
    %c0_64 = arith.constant 0 : index
    %c0_65 = arith.constant 0 : index
    %139 = vector.load %arg18[%c0_64, %c0_65] : memref<8x1xf32, #tpu.memory_space<vmem>>, vector<8x1xf32>
    %c0_66 = arith.constant 0 : index
    %c0_67 = arith.constant 0 : index
    %140 = vector.load %arg19[%c0_66, %c0_67] : memref<8x1xf32, #tpu.memory_space<vmem>>, vector<8x1xf32>
    %c0_68 = arith.constant 0 : index
    %c0_69 = arith.constant 0 : index
    %141 = vector.load %arg20[%c0_68, %c0_69] : memref<8x128xf32, #tpu.memory_space<vmem>>, vector<8x128xf32>
    %c0_i32_70 = arith.constant 0 : i32
    %142 = arith.index_cast %c0_i32_70 : i32 to index
    %c0_71 = arith.constant 0 : index
    %c0_72 = arith.constant 0 : index
    %143 = vector.load %arg12[%142, %c0_71, %c0_72] : memref<4x8x512xf32, #tpu.memory_space<vmem>>, vector<1x8x512xf32>
    %144 = vector.shape_cast %143 : vector<1x8x512xf32> to vector<8x512xf32>
    %145 = arith.truncf %137 : vector<8x128xf32> to vector<8x128xbf16>
    %cst_73 = arith.constant dense<0.000000e+00> : vector<8x512xf32>
    %146 = tpu.matmul %145, %4, %cst_73 {dimension_numbers = #tpu.dot_dimension_numbers<[1], [0], [0], [1], [0, 0, 1, 1], [], []>} : vector<8x128xbf16>, vector<128x512xbf16>, vector<8x512xf32> -> vector<8x512xf32>
    %147 = arith.addf %144, %146 : vector<8x512xf32>
    %148 = vector.broadcast %6 : vector<1x512xf32> to vector<8x512xf32>
    %149 = arith.addf %147, %148 : vector<8x512xf32>
    %150 = vector.extract_strided_slice %149 {offsets = [0, 0], sizes = [8, 384], strides = [1, 1]} : vector<8x512xf32> to vector<8x384xf32>
    %151 = arith.negf %150 : vector<8x384xf32>
    %152 = math.exp %151 : vector<8x384xf32>
    %cst_74 = arith.constant 1.000000e+00 : f32
    %153 = vector.broadcast %cst_74 : f32 to vector<8x384xf32>
    %154 = arith.addf %153, %152 : vector<8x384xf32>
    %155 = arith.divf %153, %154 : vector<8x384xf32>
    %156 = vector.extract_strided_slice %155 {offsets = [0, 0], sizes = [8, 128], strides = [1, 1]} : vector<8x384xf32> to vector<8x128xf32>
    %157 = vector.extract_strided_slice %155 {offsets = [0, 128], sizes = [8, 128], strides = [1, 1]} : vector<8x384xf32> to vector<8x128xf32>
    %158 = vector.extract_strided_slice %155 {offsets = [0, 256], sizes = [8, 128], strides = [1, 1]} : vector<8x384xf32> to vector<8x128xf32>
    %159 = vector.extract_strided_slice %149 {offsets = [0, 384], sizes = [8, 128], strides = [1, 1]} : vector<8x512xf32> to vector<8x128xf32>
    %160 = math.tanh %159 : vector<8x128xf32>
    %161 = arith.mulf %157, %138 : vector<8x128xf32>
    %162 = arith.mulf %156, %160 : vector<8x128xf32>
    %163 = arith.addf %161, %162 : vector<8x128xf32>
    %164 = math.tanh %163 : vector<8x128xf32>
    %165 = arith.mulf %158, %164 : vector<8x128xf32>
    %166 = vector.broadcast %7 : vector<1x128xf32> to vector<8x128xf32>
    %167 = arith.mulf %165, %166 : vector<8x128xf32>
    %cst_75 = arith.constant dense<0.000000e+00> : vector<8xf32>
    %168 = vector.multi_reduction <add>, %167, %cst_75 [1] : vector<8x128xf32> to vector<8xf32>
    %169 = vector.shape_cast %168 : vector<8xf32> to vector<8x1xf32>
    %c4_i32_76 = arith.constant 4 : i32
    %170 = arith.muli %arg0, %c4_i32_76 : i32
    %171 = arith.addi %170, %c0_i32_70 : i32
    %c10_i32 = arith.constant 10 : i32
    %172 = arith.cmpi slt, %171, %c10_i32 : i32
    %173 = arith.maximumf %139, %169 : vector<8x1xf32>
    %174 = arith.select %172, %173, %139 : vector<8x1xf32>
    %175 = arith.subf %169, %174 : vector<8x1xf32>
    %176 = math.exp %175 : vector<8x1xf32>
    %cst_77 = arith.constant 0.000000e+00 : f32
    %177 = vector.broadcast %cst_77 : f32 to vector<8x1xf32>
    %178 = arith.select %172, %176, %177 : vector<8x1xf32>
    %179 = arith.subf %139, %174 : vector<8x1xf32>
    %180 = math.exp %179 : vector<8x1xf32>
    %181 = arith.mulf %180, %140 : vector<8x1xf32>
    %182 = arith.addf %181, %178 : vector<8x1xf32>
    %183 = vector.broadcast %180 : vector<8x1xf32> to vector<8x128xf32>
    %184 = arith.mulf %183, %141 : vector<8x128xf32>
    %185 = vector.broadcast %178 : vector<8x1xf32> to vector<8x128xf32>
    %186 = arith.mulf %185, %165 : vector<8x128xf32>
    %187 = arith.addf %184, %186 : vector<8x128xf32>
    %c1_i32_78 = arith.constant 1 : i32
    %188 = arith.index_cast %c1_i32_78 : i32 to index
    %c0_79 = arith.constant 0 : index
    %c0_80 = arith.constant 0 : index
    %189 = vector.load %arg12[%188, %c0_79, %c0_80] : memref<4x8x512xf32, #tpu.memory_space<vmem>>, vector<1x8x512xf32>
    %190 = vector.shape_cast %189 : vector<1x8x512xf32> to vector<8x512xf32>
    %191 = arith.truncf %165 : vector<8x128xf32> to vector<8x128xbf16>
    %cst_81 = arith.constant dense<0.000000e+00> : vector<8x512xf32>
    %192 = tpu.matmul %191, %4, %cst_81 {dimension_numbers = #tpu.dot_dimension_numbers<[1], [0], [0], [1], [0, 0, 1, 1], [], []>} : vector<8x128xbf16>, vector<128x512xbf16>, vector<8x512xf32> -> vector<8x512xf32>
    %193 = arith.addf %190, %192 : vector<8x512xf32>
    %194 = vector.broadcast %6 : vector<1x512xf32> to vector<8x512xf32>
    %195 = arith.addf %193, %194 : vector<8x512xf32>
    %196 = vector.extract_strided_slice %195 {offsets = [0, 0], sizes = [8, 384], strides = [1, 1]} : vector<8x512xf32> to vector<8x384xf32>
    %197 = arith.negf %196 : vector<8x384xf32>
    %198 = math.exp %197 : vector<8x384xf32>
    %cst_82 = arith.constant 1.000000e+00 : f32
    %199 = vector.broadcast %cst_82 : f32 to vector<8x384xf32>
    %200 = arith.addf %199, %198 : vector<8x384xf32>
    %201 = arith.divf %199, %200 : vector<8x384xf32>
    %202 = vector.extract_strided_slice %201 {offsets = [0, 0], sizes = [8, 128], strides = [1, 1]} : vector<8x384xf32> to vector<8x128xf32>
    %203 = vector.extract_strided_slice %201 {offsets = [0, 128], sizes = [8, 128], strides = [1, 1]} : vector<8x384xf32> to vector<8x128xf32>
    %204 = vector.extract_strided_slice %201 {offsets = [0, 256], sizes = [8, 128], strides = [1, 1]} : vector<8x384xf32> to vector<8x128xf32>
    %205 = vector.extract_strided_slice %195 {offsets = [0, 384], sizes = [8, 128], strides = [1, 1]} : vector<8x512xf32> to vector<8x128xf32>
    %206 = math.tanh %205 : vector<8x128xf32>
    %207 = arith.mulf %203, %163 : vector<8x128xf32>
    %208 = arith.mulf %202, %206 : vector<8x128xf32>
    %209 = arith.addf %207, %208 : vector<8x128xf32>
    %210 = math.tanh %209 : vector<8x128xf32>
    %211 = arith.mulf %204, %210 : vector<8x128xf32>
    %212 = vector.broadcast %7 : vector<1x128xf32> to vector<8x128xf32>
    %213 = arith.mulf %211, %212 : vector<8x128xf32>
    %cst_83 = arith.constant dense<0.000000e+00> : vector<8xf32>
    %214 = vector.multi_reduction <add>, %213, %cst_83 [1] : vector<8x128xf32> to vector<8xf32>
    %215 = vector.shape_cast %214 : vector<8xf32> to vector<8x1xf32>
    %c4_i32_84 = arith.constant 4 : i32
    %216 = arith.muli %arg0, %c4_i32_84 : i32
    %217 = arith.addi %216, %c1_i32_78 : i32
    %c10_i32_85 = arith.constant 10 : i32
    %218 = arith.cmpi slt, %217, %c10_i32_85 : i32
    %219 = arith.maximumf %174, %215 : vector<8x1xf32>
    %220 = arith.select %218, %219, %174 : vector<8x1xf32>
    %221 = arith.subf %215, %220 : vector<8x1xf32>
    %222 = math.exp %221 : vector<8x1xf32>
    %cst_86 = arith.constant 0.000000e+00 : f32
    %223 = vector.broadcast %cst_86 : f32 to vector<8x1xf32>
    %224 = arith.select %218, %222, %223 : vector<8x1xf32>
    %225 = arith.subf %174, %220 : vector<8x1xf32>
    %226 = math.exp %225 : vector<8x1xf32>
    %227 = arith.mulf %226, %182 : vector<8x1xf32>
    %228 = arith.addf %227, %224 : vector<8x1xf32>
    %229 = vector.broadcast %226 : vector<8x1xf32> to vector<8x128xf32>
    %230 = arith.mulf %229, %187 : vector<8x128xf32>
    %231 = vector.broadcast %224 : vector<8x1xf32> to vector<8x128xf32>
    %232 = arith.mulf %231, %211 : vector<8x128xf32>
    %233 = arith.addf %230, %232 : vector<8x128xf32>
    %c2_i32_87 = arith.constant 2 : i32
    %234 = arith.index_cast %c2_i32_87 : i32 to index
    %c0_88 = arith.constant 0 : index
    %c0_89 = arith.constant 0 : index
    %235 = vector.load %arg12[%234, %c0_88, %c0_89] : memref<4x8x512xf32, #tpu.memory_space<vmem>>, vector<1x8x512xf32>
    %236 = vector.shape_cast %235 : vector<1x8x512xf32> to vector<8x512xf32>
    %237 = arith.truncf %211 : vector<8x128xf32> to vector<8x128xbf16>
    %cst_90 = arith.constant dense<0.000000e+00> : vector<8x512xf32>
    %238 = tpu.matmul %237, %4, %cst_90 {dimension_numbers = #tpu.dot_dimension_numbers<[1], [0], [0], [1], [0, 0, 1, 1], [], []>} : vector<8x128xbf16>, vector<128x512xbf16>, vector<8x512xf32> -> vector<8x512xf32>
    %239 = arith.addf %236, %238 : vector<8x512xf32>
    %240 = vector.broadcast %6 : vector<1x512xf32> to vector<8x512xf32>
    %241 = arith.addf %239, %240 : vector<8x512xf32>
    %242 = vector.extract_strided_slice %241 {offsets = [0, 0], sizes = [8, 384], strides = [1, 1]} : vector<8x512xf32> to vector<8x384xf32>
    %243 = arith.negf %242 : vector<8x384xf32>
    %244 = math.exp %243 : vector<8x384xf32>
    %cst_91 = arith.constant 1.000000e+00 : f32
    %245 = vector.broadcast %cst_91 : f32 to vector<8x384xf32>
    %246 = arith.addf %245, %244 : vector<8x384xf32>
    %247 = arith.divf %245, %246 : vector<8x384xf32>
    %248 = vector.extract_strided_slice %247 {offsets = [0, 0], sizes = [8, 128], strides = [1, 1]} : vector<8x384xf32> to vector<8x128xf32>
    %249 = vector.extract_strided_slice %247 {offsets = [0, 128], sizes = [8, 128], strides = [1, 1]} : vector<8x384xf32> to vector<8x128xf32>
    %250 = vector.extract_strided_slice %247 {offsets = [0, 256], sizes = [8, 128], strides = [1, 1]} : vector<8x384xf32> to vector<8x128xf32>
    %251 = vector.extract_strided_slice %241 {offsets = [0, 384], sizes = [8, 128], strides = [1, 1]} : vector<8x512xf32> to vector<8x128xf32>
    %252 = math.tanh %251 : vector<8x128xf32>
    %253 = arith.mulf %249, %209 : vector<8x128xf32>
    %254 = arith.mulf %248, %252 : vector<8x128xf32>
    %255 = arith.addf %253, %254 : vector<8x128xf32>
    %256 = math.tanh %255 : vector<8x128xf32>
    %257 = arith.mulf %250, %256 : vector<8x128xf32>
    %258 = vector.broadcast %7 : vector<1x128xf32> to vector<8x128xf32>
    %259 = arith.mulf %257, %258 : vector<8x128xf32>
    %cst_92 = arith.constant dense<0.000000e+00> : vector<8xf32>
    %260 = vector.multi_reduction <add>, %259, %cst_92 [1] : vector<8x128xf32> to vector<8xf32>
    %261 = vector.shape_cast %260 : vector<8xf32> to vector<8x1xf32>
    %c4_i32_93 = arith.constant 4 : i32
    %262 = arith.muli %arg0, %c4_i32_93 : i32
    %263 = arith.addi %262, %c2_i32_87 : i32
    %c10_i32_94 = arith.constant 10 : i32
    %264 = arith.cmpi slt, %263, %c10_i32_94 : i32
    %265 = arith.maximumf %220, %261 : vector<8x1xf32>
    %266 = arith.select %264, %265, %220 : vector<8x1xf32>
    %267 = arith.subf %261, %266 : vector<8x1xf32>
    %268 = math.exp %267 : vector<8x1xf32>
    %cst_95 = arith.constant 0.000000e+00 : f32
    %269 = vector.broadcast %cst_95 : f32 to vector<8x1xf32>
    %270 = arith.select %264, %268, %269 : vector<8x1xf32>
    %271 = arith.subf %220, %266 : vector<8x1xf32>
    %272 = math.exp %271 : vector<8x1xf32>
    %273 = arith.mulf %272, %228 : vector<8x1xf32>
    %274 = arith.addf %273, %270 : vector<8x1xf32>
    %275 = vector.broadcast %272 : vector<8x1xf32> to vector<8x128xf32>
    %276 = arith.mulf %275, %233 : vector<8x128xf32>
    %277 = vector.broadcast %270 : vector<8x1xf32> to vector<8x128xf32>
    %278 = arith.mulf %277, %257 : vector<8x128xf32>
    %279 = arith.addf %276, %278 : vector<8x128xf32>
    %c3_i32_96 = arith.constant 3 : i32
    %280 = arith.index_cast %c3_i32_96 : i32 to index
    %c0_97 = arith.constant 0 : index
    %c0_98 = arith.constant 0 : index
    %281 = vector.load %arg12[%280, %c0_97, %c0_98] : memref<4x8x512xf32, #tpu.memory_space<vmem>>, vector<1x8x512xf32>
    %282 = vector.shape_cast %281 : vector<1x8x512xf32> to vector<8x512xf32>
    %283 = arith.truncf %257 : vector<8x128xf32> to vector<8x128xbf16>
    %cst_99 = arith.constant dense<0.000000e+00> : vector<8x512xf32>
    %284 = tpu.matmul %283, %4, %cst_99 {dimension_numbers = #tpu.dot_dimension_numbers<[1], [0], [0], [1], [0, 0, 1, 1], [], []>} : vector<8x128xbf16>, vector<128x512xbf16>, vector<8x512xf32> -> vector<8x512xf32>
    %285 = arith.addf %282, %284 : vector<8x512xf32>
    %286 = vector.broadcast %6 : vector<1x512xf32> to vector<8x512xf32>
    %287 = arith.addf %285, %286 : vector<8x512xf32>
    %288 = vector.extract_strided_slice %287 {offsets = [0, 0], sizes = [8, 384], strides = [1, 1]} : vector<8x512xf32> to vector<8x384xf32>
    %289 = arith.negf %288 : vector<8x384xf32>
    %290 = math.exp %289 : vector<8x384xf32>
    %cst_100 = arith.constant 1.000000e+00 : f32
    %291 = vector.broadcast %cst_100 : f32 to vector<8x384xf32>
    %292 = arith.addf %291, %290 : vector<8x384xf32>
    %293 = arith.divf %291, %292 : vector<8x384xf32>
    %294 = vector.extract_strided_slice %293 {offsets = [0, 0], sizes = [8, 128], strides = [1, 1]} : vector<8x384xf32> to vector<8x128xf32>
    %295 = vector.extract_strided_slice %293 {offsets = [0, 128], sizes = [8, 128], strides = [1, 1]} : vector<8x384xf32> to vector<8x128xf32>
    %296 = vector.extract_strided_slice %293 {offsets = [0, 256], sizes = [8, 128], strides = [1, 1]} : vector<8x384xf32> to vector<8x128xf32>
    %297 = vector.extract_strided_slice %287 {offsets = [0, 384], sizes = [8, 128], strides = [1, 1]} : vector<8x512xf32> to vector<8x128xf32>
    %298 = math.tanh %297 : vector<8x128xf32>
    %299 = arith.mulf %295, %255 : vector<8x128xf32>
    %300 = arith.mulf %294, %298 : vector<8x128xf32>
    %301 = arith.addf %299, %300 : vector<8x128xf32>
    %302 = math.tanh %301 : vector<8x128xf32>
    %303 = arith.mulf %296, %302 : vector<8x128xf32>
    %304 = vector.broadcast %7 : vector<1x128xf32> to vector<8x128xf32>
    %305 = arith.mulf %303, %304 : vector<8x128xf32>
    %cst_101 = arith.constant dense<0.000000e+00> : vector<8xf32>
    %306 = vector.multi_reduction <add>, %305, %cst_101 [1] : vector<8x128xf32> to vector<8xf32>
    %307 = vector.shape_cast %306 : vector<8xf32> to vector<8x1xf32>
    %c4_i32_102 = arith.constant 4 : i32
    %308 = arith.muli %arg0, %c4_i32_102 : i32
    %309 = arith.addi %308, %c3_i32_96 : i32
    %c10_i32_103 = arith.constant 10 : i32
    %310 = arith.cmpi slt, %309, %c10_i32_103 : i32
    %311 = arith.maximumf %266, %307 : vector<8x1xf32>
    %312 = arith.select %310, %311, %266 : vector<8x1xf32>
    %313 = arith.subf %307, %312 : vector<8x1xf32>
    %314 = math.exp %313 : vector<8x1xf32>
    %cst_104 = arith.constant 0.000000e+00 : f32
    %315 = vector.broadcast %cst_104 : f32 to vector<8x1xf32>
    %316 = arith.select %310, %314, %315 : vector<8x1xf32>
    %317 = arith.subf %266, %312 : vector<8x1xf32>
    %318 = math.exp %317 : vector<8x1xf32>
    %319 = arith.mulf %318, %274 : vector<8x1xf32>
    %320 = arith.addf %319, %316 : vector<8x1xf32>
    %321 = vector.broadcast %318 : vector<8x1xf32> to vector<8x128xf32>
    %322 = arith.mulf %321, %279 : vector<8x128xf32>
    %323 = vector.broadcast %316 : vector<8x1xf32> to vector<8x128xf32>
    %324 = arith.mulf %323, %303 : vector<8x128xf32>
    %325 = arith.addf %322, %324 : vector<8x128xf32>
    %c4_i32_105 = arith.constant 4 : i32
    %c0_106 = arith.constant 0 : index
    %c0_107 = arith.constant 0 : index
    %326 = vector.load %arg16[%c0_106, %c0_107] : memref<8x128xf32, #tpu.memory_space<vmem>>, vector<8x128xf32>
    tpu.vector_store %arg16[%c0_106, %c0_107], %303 {strides = array<i32>} : memref<8x128xf32, #tpu.memory_space<vmem>>, vector<8x128xf32>,
    %c0_108 = arith.constant 0 : index
    %c0_109 = arith.constant 0 : index
    %327 = vector.load %arg17[%c0_108, %c0_109] : memref<8x128xf32, #tpu.memory_space<vmem>>, vector<8x128xf32>
    tpu.vector_store %arg17[%c0_108, %c0_109], %301 {strides = array<i32>} : memref<8x128xf32, #tpu.memory_space<vmem>>, vector<8x128xf32>,
    %c0_110 = arith.constant 0 : index
    %c0_111 = arith.constant 0 : index
    %328 = vector.load %arg18[%c0_110, %c0_111] : memref<8x1xf32, #tpu.memory_space<vmem>>, vector<8x1xf32>
    tpu.vector_store %arg18[%c0_110, %c0_111], %312 {strides = array<i32>} : memref<8x1xf32, #tpu.memory_space<vmem>>, vector<8x1xf32>,
    %c0_112 = arith.constant 0 : index
    %c0_113 = arith.constant 0 : index
    %329 = vector.load %arg19[%c0_112, %c0_113] : memref<8x1xf32, #tpu.memory_space<vmem>>, vector<8x1xf32>
    tpu.vector_store %arg19[%c0_112, %c0_113], %320 {strides = array<i32>} : memref<8x1xf32, #tpu.memory_space<vmem>>, vector<8x1xf32>,
    %c0_114 = arith.constant 0 : index
    %c0_115 = arith.constant 0 : index
    %330 = vector.load %arg20[%c0_114, %c0_115] : memref<8x128xf32, #tpu.memory_space<vmem>>, vector<8x128xf32>
    tpu.vector_store %arg20[%c0_114, %c0_115], %325 {strides = array<i32>} : memref<8x128xf32, #tpu.memory_space<vmem>>, vector<8x128xf32>,
    %c2_i32_116 = arith.constant 2 : i32
    %331 = arith.cmpi eq, %arg0, %c2_i32_116 : i32
    %332 = arith.extui %331 : i1 to i32
    %c0_i32_117 = arith.constant 0 : i32
    %333 = arith.cmpi ne, %332, %c0_i32_117 : i32
    scf.if %333 {
      %334 = vector.broadcast %320 : vector<8x1xf32> to vector<8x128xf32>
      %335 = arith.divf %325, %334 : vector<8x128xf32>
      %336 = arith.truncf %335 : vector<8x128xf32> to vector<8x128xbf16>
      %c0_118 = arith.constant 0 : index
      %c0_119 = arith.constant 0 : index
      %337 = vector.load %arg9[%c0_118, %c0_119] : memref<128x128xbf16, #tpu.memory_space<vmem>>, vector<128x128xbf16>
      %cst_120 = arith.constant dense<0.000000e+00> : vector<8x128xf32>
      %338 = tpu.matmul %336, %337, %cst_120 {dimension_numbers = #tpu.dot_dimension_numbers<[1], [0], [0], [1], [0, 0, 1, 1], [], []>} : vector<8x128xbf16>, vector<128x128xbf16>, vector<8x128xf32> -> vector<8x128xf32>
      %c0_121 = arith.constant 0 : index
      %c0_122 = arith.constant 0 : index
      %339 = vector.load %arg10[%c0_121, %c0_122] : memref<1x128xf32, #tpu.memory_space<vmem>>, vector<1x128xf32>
      %340 = vector.broadcast %339 : vector<1x128xf32> to vector<8x128xf32>
      %341 = arith.addf %338, %340 : vector<8x128xf32>
      %c0_123 = arith.constant 0 : index
      %c0_124 = arith.constant 0 : index
      %342 = vector.load %arg11[%c0_123, %c0_124] : memref<8x128xf32, #tpu.memory_space<vmem>>, vector<8x128xf32>
      tpu.vector_store %arg11[%c0_123, %c0_124], %341 {strides = array<i32>} : memref<8x128xf32, #tpu.memory_space<vmem>>, vector<8x128xf32>,
    } else {
    }
    return
  }
  func.func @transform_0(%arg0: i32) -> (i32, i32, i32) {
    %c0_i32 = arith.constant 0 : i32
    %c0_i32_0 = arith.constant 0 : i32
    %c0_i32_1 = arith.constant 0 : i32
    return %arg0, %c0_i32, %c0_i32_0 : i32, i32, i32
  }
  func.func @transform_1(%arg0: i32) -> (i32, i32) {
    %c0_i32 = arith.constant 0 : i32
    %c0_i32_0 = arith.constant 0 : i32
    %c0_i32_1 = arith.constant 0 : i32
    return %c0_i32, %c0_i32_0 : i32, i32
  }
  func.func @transform_2(%arg0: i32) -> (i32, i32) {
    %c0_i32 = arith.constant 0 : i32
    %c0_i32_0 = arith.constant 0 : i32
    %c0_i32_1 = arith.constant 0 : i32
    return %c0_i32, %c0_i32_0 : i32, i32
  }
  func.func @transform_3(%arg0: i32) -> (i32, i32) {
    %c0_i32 = arith.constant 0 : i32
    %c0_i32_0 = arith.constant 0 : i32
    %c0_i32_1 = arith.constant 0 : i32
    return %c0_i32, %c0_i32_0 : i32, i32
  }
  func.func @transform_4(%arg0: i32) -> (i32, i32) {
    %c0_i32 = arith.constant 0 : i32
    %c0_i32_0 = arith.constant 0 : i32
    %c0_i32_1 = arith.constant 0 : i32
    return %c0_i32, %c0_i32_0 : i32, i32
  }
  func.func @transform_5(%arg0: i32) -> (i32, i32) {
    %c0_i32 = arith.constant 0 : i32
    %c0_i32_0 = arith.constant 0 : i32
    %c0_i32_1 = arith.constant 0 : i32
    return %c0_i32, %c0_i32_0 : i32, i32
  }
  func.func @transform_6(%arg0: i32) -> (i32, i32) {
    %c0_i32 = arith.constant 0 : i32
    %c0_i32_0 = arith.constant 0 : i32
    %c0_i32_1 = arith.constant 0 : i32
    return %c0_i32, %c0_i32_0 : i32, i32
  }
  func.func @transform_7(%arg0: i32) -> (i32, i32) {
    %c0_i32 = arith.constant 0 : i32
    %c0_i32_0 = arith.constant 0 : i32
    %c0_i32_1 = arith.constant 0 : i32
    return %c0_i32, %c0_i32_0 : i32, i32
  }
  func.func @transform_8(%arg0: i32) -> (i32, i32) {
    %c0_i32 = arith.constant 0 : i32
    %c0_i32_0 = arith.constant 0 : i32
    %c0_i32_1 = arith.constant 0 : i32
    return %c0_i32, %c0_i32_0 : i32, i32
  }
  func.func @transform_9(%arg0: i32) -> (i32, i32) {
    %c0_i32 = arith.constant 0 : i32
    %c0_i32_0 = arith.constant 0 : i32
    %c0_i32_1 = arith.constant 0 : i32
    return %c0_i32, %c0_i32_0 : i32, i32
  }
  func.func @transform_10(%arg0: i32) -> (i32, i32) {
    %c0_i32 = arith.constant 0 : i32
    %c0_i32_0 = arith.constant 0 : i32
    %c0_i32_1 = arith.constant 0 : i32
    return %c0_i32, %c0_i32_0 : i32, i32
  }
}

</mosaic_0001>

<bundles_post_ra>
// kernel: lstm_attention_forward.1
= control target key start
LH: loop header
LB: loop body
LE: loop exit
PB: predicated region body
PF: predicated region fallthrough
CT: control target
= control target key end

     0   :  { %15 = vsyncpa [#allocation12], 0  ;;  %s4647_s0 = inlined_call_operand.vmem [shape: bf16[12,8,128], index: 0, kind: input, shape index: {}]   ;;  %s4648_s1 = inlined_call_operand.vmem [shape: bf16[128,512], index: 1, kind: input, shape index: {}]   ;;  %s4649_s2 = inlined_call_operand.vmem [shape: bf16[128,512], index: 2, kind: input, shape index: {}]   ;;  %s4650_s3 = inlined_call_operand.hbm [shape: f32[1,512], index: 3, kind: input, shape index: {}]   ;;  %s4651_s4 = inlined_call_operand.hbm [shape: bf16[128,512], index: 4, kind: input, shape index: {}]   ;;  %s4652_s5 = inlined_call_operand.hbm [shape: bf16[128,512], index: 5, kind: input, shape index: {}]   ;;  %s4653_s6 = inlined_call_operand.hbm [shape: f32[1,512], index: 6, kind: input, shape index: {}]   ;;  %s4654_s7 = inlined_call_operand.vmem [shape: f32[1,128], index: 7, kind: input, shape index: {}]   ;;  %s4655_s8 = inlined_call_operand.hbm [shape: bf16[128,128], index: 8, kind: input, shape index: {}]   ;;  %s4656_s9 = inlined_call_operand.vmem [shape: f32[1,128], index: 9, kind: input, shape index: {}]   ;;  %s4657_s10 = inlined_call_operand.vmem [shape: f32[8,128], index: 10, kind: output, shape index: {}]  }
   0x1   :  { %16 = vsyncpa [#allocation14], 0 }
   0x2   :  { %17 = vsyncpa [#allocation17], 0  ;;  %s3675_s13 = smov 0  }
   0x3 LB: > { %s3605_s14 = smov [#allocation13]   ;;  %s3681_s16 = sadd.s32 4294967295, %s3603_s13   ;;  %s3603_s13 = sphi %s3675_s13, %s23_s13  }
   0x4   : > { %s293_s15 = sshll.u32 %s3605_s14, 4  ;;  %p2822_p0 = scmp.ge.s32.totalorder %s3603_s13, 1  ;;  %s294_s15 = int_to_ptr.vmem [resolvable:$true] %s293_s15 }
   0x5   : > { %p264_p1 = scmp.lt.s32.totalorder %s3603_s13, 4  ;;  %p3071_p3 = scmp.eq.s32.totalorder %s3681_s16, 0 }
   0x6   : > { %s3606_s18 = smov [#allocation16]   ;;  %s3607_s21 = smov [#allocation11]  }
   0x7   : > { %p3687_p4 = pnand %p2822_p0, %p264_p1  ;;  %s320_s19 = sshll.u32 %s3606_s18, 4  ;;  %s3693_s19 = int_to_ptr.vmem [resolvable:$true] %s320_s19 }
   0x8   : > { %s283_s22 = sshll.u32 %s3607_s21, 4  ;;  %s3608_s23 = smov [#allocation15]   ;;  %s3701_s22 = int_to_ptr.vmem [resolvable:$true] %s283_s22 }
   0x9   : > { %p3055_p5 = pneg %p3687_p4  ;;  %s3703_s24 = sshll.u32 %s3608_s23, 4  ;;  %s307_s24 = int_to_ptr.vmem [resolvable:$true] %s3703_s24 }
   0xa   : > { %s3466_s26 = scalar_lea.vmem %s294_s15, 4096  ;;  %p3474_p11 = scmp.lt.s32.totalorder %s294_s15, %s294_s15 }
   0xb   : > { %p3697_p6 = pnand %p3071_p3, %p3055_p5  ;;  %p3467_p8 = scmp.ne.s32.totalorder %s294_s15, %s3466_s26 }
   0xc   : > { %p3475_p12 = scmp.lt.s32.totalorder %s3466_s26, %s3466_s26 }
   0xd   : > { %p3707_p7 = pneg %p3697_p6 }
   0xe   : > { %p3476_p13 = por %p3475_p12, %p3474_p11 }
   0xf   : > { %p3469_p9 = pnand %p3467_p8, %p3707_p7 }
  0x11   : > { %p3470_p10 = pneg %p3469_p9 }
  0x13   : > { %p3477_p0 = pnand %p3476_p13, %p3470_p10 }
  0x15   : > { %3480 = shalt.err (!%p3477_p0)
}
  0x16   : > { %s3609_s27 = smov 256   ;;  %s3610_s28 = smov 16  }
  0x17   : > { %3061 = dma.hbm_to_vmem [thread:$0]  (!%p3697_p6), %s4651_s4, 4096, %s294_s15, [#allocation14], %s3609_s27, %s3609_s27, %s3610_s28  }
  0x18   : > { %s3492_s11 = scalar_lea.vmem %s3693_s19, 64  ;;  %p3500_p9 = scmp.lt.s32.totalorder %s3693_s19, %s3693_s19 }
  0x19   : > { %p3493_p1 = scmp.ne.s32.totalorder %s3693_s19, %s3492_s11  ;;  %p3501_p10 = scmp.lt.s32.totalorder %s3492_s11, %s3492_s11 }
  0x1b   : > { %p3495_p5 = pnand %p3493_p1, %p3707_p7  ;;  %p3502_p11 = por %p3501_p10, %p3500_p9 }
  0x1d   : > { %p3496_p8 = pneg %p3495_p5 }
  0x1f   : > { %p3503_p12 = pnand %p3502_p11, %p3496_p8 }
  0x21   : > { %3506 = shalt.err (!%p3503_p12)
}
  0x22   : > { %3067 = dma.hbm_to_vmem [thread:$0]  (!%p3697_p6), %s4653_s6, 64, %s3693_s19, [#allocation17]  }
  0x23   : > { %s3518_s15 = scalar_lea.vmem %s3701_s22, 64  ;;  %p3526_p5 = scmp.lt.s32.totalorder %s3701_s22, %s3701_s22 }
  0x24   : > { %p3519_p13 = scmp.ne.s32.totalorder %s3701_s22, %s3518_s15  ;;  %p3527_p8 = scmp.lt.s32.totalorder %s3518_s15, %s3518_s15 }
  0x26   : > { %p3521_p0 = pnand %p3519_p13, %p3707_p7  ;;  %p3528_p9 = por %p3527_p8, %p3526_p5 }
  0x28   : > { %p3522_p1 = pneg %p3521_p0 }
  0x2a   : > { %p3529_p10 = pnand %p3528_p9, %p3522_p1 }
  0x2c   : > { %3532 = shalt.err (!%p3529_p10)
}
  0x2d   : > { %3058 = dma.hbm_to_vmem [thread:$0]  (!%p3697_p6), %s4650_s3, 64, %s3701_s22, [#allocation12]  }
  0x2e   : > { %s3544_s19 = scalar_lea.vmem %s307_s24, 4096  ;;  %p3552_p0 = scmp.lt.s32.totalorder %s307_s24, %s307_s24 }
  0x2f   : > { %p3545_p11 = scmp.ne.s32.totalorder %s307_s24, %s3544_s19  ;;  %p3553_p2 = scmp.lt.s32.totalorder %s3544_s19, %s3544_s19 }
  0x31   : > { %p3547_p12 = pnand %p3545_p11, %p3707_p7  ;;  %p3554_p5 = por %p3553_p2, %p3552_p0 }
  0x33   : > { %p3548_p13 = pneg %p3547_p12 }
  0x35   : > { %p3555_p1 = pnand %p3554_p5, %p3548_p13 }
  0x37   : > { %3558 = shalt.err (!%p3555_p1)
}
  0x38   : > { %3064 = dma.hbm_to_vmem [thread:$0]  (!%p3697_p6), %s4652_s5, 4096, %s307_s24, [#allocation14], %s3609_s27, %s3609_s27, %s3610_s28  }
  0x39   : > { %s3611_s22 = smov [#allocation18]  }
  0x3a   : > { %s333_s29 = sshll.u32 %s3611_s22, 4  ;;  %s334_s29 = int_to_ptr.vmem [resolvable:$true] %s333_s29 }
  0x3b   : > { %s3570_s30 = scalar_lea.vmem %s334_s29, 1024  ;;  %p3578_p10 = scmp.lt.s32.totalorder %s334_s29, %s334_s29 }
  0x3c   : > { %p3571_p8 = scmp.ne.s32.totalorder %s334_s29, %s3570_s30  ;;  %p3579_p11 = scmp.lt.s32.totalorder %s3570_s30, %s3570_s30 }
  0x3e   : > { %p3573_p9 = pnand %p3571_p8, %p3707_p7  ;;  %p3580_p12 = por %p3579_p11, %p3578_p10 }
  0x40   : > { %p3574_p2 = pneg %p3573_p9 }
  0x42   : > { %p3581_p13 = pnand %p3580_p12, %p3574_p2 }
  0x44   : > { %3584 = shalt.err (!%p3581_p13)
}
  0x45   : > { %s3612_s11 = smov 64   ;;  %s3613_s12 = smov 4  }
  0x46   : > { %3070 = dma.hbm_to_vmem [thread:$0]  (!%p3697_p6), %s4655_s8, 1024, %s334_s29, [#allocation17], %s3612_s11, %s3612_s11, %s3613_s12  }
  0x47   : > { %361 = sbr.rel (%p3687_p4) target bundleno = 2828 (0xb0c), region = 60 }
  0x4c   : > { %3590 = dma.done.wait (%p3071_p3), [#allocation12], 64  }
  0x4d   : > { %3592 = vsyncadd (%p3071_p3), [#allocation12], 4294967232 }
  0x4e   : > { %3594 = dma.done.wait (%p3071_p3), [#allocation14], 8192  }
  0x4f   : > { %3596 = vsyncadd (%p3071_p3), [#allocation14], 4294959104 }
  0x50   : > { %3598 = dma.done.wait (%p3071_p3), [#allocation17], 1088  }
  0x51   : > { %3600 = vsyncadd (%p3071_p3), [#allocation17], 4294966208  ;;  %s3778_s17 = sshll.u32 %s3681_s16, 2  ;;  %p4667_p6 = scmp.ne.s32.totalorder %s3681_s16, 0 }
  0x52   : > { %p411_p4 = scmp.lt.s32.totalorder %s3778_s17, 11 }
  0x53   : > { %420 = sbr.rel (%p4667_p6) target bundleno = 93 (0x5d), region = 84 }
  0x54   : > { %s412_s20 = scalar_select %p411_p4, %s3778_s17, 11 }
  0x56   : > { %s2836_s24 = sshll.u32 %s412_s20, 2 }
  0x57   : > { %s3785_s28 = scalar_lea.vmem %s4647_s0, %s2836_s24 }
  0x58   : > { %vm425_vm0 = vcmask 7168   ;;  %v3614_v0 = vmov 0.0   ;;  %v3615_v1 = vmov -1e+30  }
  0x59   : > { %421 = vst [vmem:[#allocation4] sm:$0xff] %v3614_v0  ;;  %422 = vst [vmem:[#allocation5] sm:$0xff] %v3614_v0 }
  0x5a   : > { %423 = vst [vmem:[#allocation6] sm:$0xff] %v3614_v0  ;;  %424 = vst [vmem:[#allocation7] sm:$0xff] %v3614_v0 }
  0x5b   : > { %428 = vst [vmem:[#allocation10] sm:$0xff] %v3614_v0  ;;  %426 = vst.msk [vmem:[#allocation8] sm:$0xff] %vm425_vm0, %v3615_v1 }
  0x5c   : > { %427 = vst.msk [vmem:[#allocation9] sm:$0xff] %vm425_vm0, %v3614_v0 }
  0x5d PF: > { %v3106_v2 = vld [vmem:[%s4648_s1 + $0xe4] ss:$16 sps:$4 sm:$0xff]   ;;  %v3108_v3 = vld [vmem:[%s4648_s1 + $0xec] ss:$16 sps:$4 sm:$0xff]   ;;  %v4658_v4 = vmov 0   ;;  %p2132_p3 = scmp.lt.s32.totalorder %s3778_s17, 10 }
  0x5e   : > { %736 = vmatprep.mubr.bf16.mxu0 %v4658_v4  ;;  %789 = vmatprep.mubr.bf16.mxu1 %v4658_v4  ;;  %v3110_v5 = vld [vmem:[%s4648_s1 + $0xe0] ss:$16 sps:$4 sm:$0xff]   ;;  %v3111_v6 = vld [vmem:[%s4648_s1 + $0xe8] ss:$16 sps:$4 sm:$0xff]   ;;  %v3112_v7 = vld [vmem:[%s4648_s1 + $0xc4] ss:$16 sps:$4 sm:$0xff]  }
  0x5f   : > { %704 = vmatprep.subr.bf16.mxu0 %v3106_v2  ;;  %3104 = vset.pattern.permute.xlu0 %v4658_v4  ;;  %v3114_v8 = vld [vmem:[%s4648_s1 + $0xcc] ss:$16 sps:$4 sm:$0xff]   ;;  %v3116_v9 = vld [vmem:[%s4648_s1 + $0xc0] ss:$16 sps:$4 sm:$0xff]   ;;  %v3117_v10 = vld [vmem:[%s4648_s1 + $0xc8] ss:$16 sps:$4 sm:$0xff]  }
  0x60   : > { %757 = vmatprep.subr.bf16.mxu1 %v3108_v3  ;;  %3105 = vset.pattern.permute.xlu1 %v4658_v4  ;;  %v3118_v11 = vld [vmem:[%s4648_s1 + $0xa4] ss:$16 sps:$4 sm:$0xff]   ;;  %v3120_v12 = vld [vmem:[%s4648_s1 + $0xac] ss:$16 sps:$4 sm:$0xff]   ;;  %v3122_v13 = vld [vmem:[%s4648_s1 + $0xa0] ss:$16 sps:$4 sm:$0xff]  }
  0x61   : > { %705 = vmatpush1.bf16.msra.mxu0 %v3110_v5  ;;  %758 = vmatpush1.bf16.msra.mxu1 %v3111_v6  ;;  %v3123_v14 = vld [vmem:[%s4648_s1 + $0xa8] ss:$16 sps:$4 sm:$0xff]   ;;  %v3124_v15 = vld [vmem:[%s4648_s1 + $0x84] ss:$16 sps:$4 sm:$0xff]   ;;  %v3126_v16 = vld [vmem:[%s4648_s1 + $0x8c] ss:$16 sps:$4 sm:$0xff]  }
  0x62   : > { %706 = vmatprep.subr.bf16.mxu0 %v3112_v7  ;;  %759 = vmatprep.subr.bf16.mxu1 %v3114_v8  ;;  %v3128_v17 = vld [vmem:[%s4648_s1 + $0x80] ss:$16 sps:$4 sm:$0xff]   ;;  %v3129_v18 = vld [vmem:[%s4648_s1 + $0x88] ss:$16 sps:$4 sm:$0xff]   ;;  %v3130_v19 = vld [vmem:[%s4648_s1 + $0x64] ss:$16 sps:$4 sm:$0xff]  }
  0x63   : > { %v3132_v20 = vld [vmem:[%s4648_s1 + $0x6c] ss:$16 sps:$4 sm:$0xff]   ;;  %v3134_v21 = vld [vmem:[%s4648_s1 + $0x60] ss:$16 sps:$4 sm:$0xff]   ;;  %v3135_v22 = vld [vmem:[%s4648_s1 + $0x68] ss:$16 sps:$4 sm:$0xff]  }
  0x64   : > { %v3136_v23 = vld [vmem:[%s4648_s1 + $0x44] ss:$16 sps:$4 sm:$0xff]   ;;  %v3138_v24 = vld [vmem:[%s4648_s1 + $0x4c] ss:$16 sps:$4 sm:$0xff]   ;;  %v3140_v25 = vld [vmem:[%s4648_s1 + $0x40] ss:$16 sps:$4 sm:$0xff]  }
  0x65   : > { %707 = vmatpush1.bf16.msra.mxu0 %v3116_v9  ;;  %760 = vmatpush1.bf16.msra.mxu1 %v3117_v10  ;;  %v3141_v26 = vld [vmem:[%s4648_s1 + $0x48] ss:$16 sps:$4 sm:$0xff]   ;;  %v3142_v27 = vld [vmem:[%s4648_s1 + $0x24] ss:$16 sps:$4 sm:$0xff]   ;;  %v3144_v28 = vld [vmem:[%s4648_s1 + $0x2c] ss:$16 sps:$4 sm:$0xff]  }
  0x66   : > { %708 = vmatprep.subr.bf16.mxu0 %v3118_v11  ;;  %761 = vmatprep.subr.bf16.mxu1 %v3120_v12  ;;  %v3146_v29 = vld [vmem:[%s4648_s1 + $0x20] ss:$16 sps:$4 sm:$0xff]   ;;  %v3147_v30 = vld [vmem:[%s4648_s1 + $0x28] ss:$16 sps:$4 sm:$0xff]   ;;  %v3148_v31 = vld [vmem:[%s4648_s1 + $0x4] ss:$16 sps:$4 sm:$0xff]  }
  0x67   : > { %v3150_v32 = vld [vmem:[%s4648_s1 + $0xc] ss:$16 sps:$4 sm:$0xff]   ;;  %v3152_v33 = vld [vmem:[%s4648_s1] ss:$16 sps:$4 sm:$0xff]   ;;  %v3153_v34 = vld [vmem:[%s4648_s1 + $0x8] ss:$16 sps:$4 sm:$0xff]  }
  0x68   : > { %v3892_v35 = vld [vmem:[%s4649_s2 + $0xe4] ss:$16 sps:$4 sm:$0xff]   ;;  %v3897_v36 = vld [vmem:[%s4649_s2 + $0xec] ss:$16 sps:$4 sm:$0xff]   ;;  %v3903_v38 = vld [vmem:[%s4649_s2 + $0xe0] ss:$16 sps:$4 sm:$0xff]  }
  0x69   : > { %709 = vmatpush1.bf16.msra.mxu0 %v3122_v13  ;;  %762 = vmatpush1.bf16.msra.mxu1 %v3123_v14  ;;  %v3154_v37 = vld [vmem:[%s3785_s28] sm:$0xff]   ;;  %v3908_v39 = vld [vmem:[%s4649_s2 + $0xe8] ss:$16 sps:$4 sm:$0xff]   ;;  %v3920_v41 = vld [vmem:[%s4649_s2 + $0xcc] ss:$16 sps:$4 sm:$0xff]   ;;  %s2282_s18 = sadd.s32 1, %s3778_s17 }
  0x6a   : > { %710 = vmatprep.subr.bf16.mxu0 %v3124_v15  ;;  %763 = vmatprep.subr.bf16.mxu1 %v3126_v16  ;;  %v3913_v40 = vld [vmem:[%s4649_s2 + $0xc4] ss:$16 sps:$4 sm:$0xff]   ;;  %v3925_v42 = vld [vmem:[%s4649_s2 + $0xc0] ss:$16 sps:$4 sm:$0xff]   ;;  %v3930_v43 = vld [vmem:[%s4649_s2 + $0xc8] ss:$16 sps:$4 sm:$0xff]  }
  0x6b   : > { %v3937_v44 = vld [vmem:[%s4649_s2 + $0xa4] ss:$16 sps:$4 sm:$0xff]   ;;  %v3944_v45 = vld [vmem:[%s4649_s2 + $0xac] ss:$16 sps:$4 sm:$0xff]   ;;  %v3949_v46 = vld [vmem:[%s4649_s2 + $0xa0] ss:$16 sps:$4 sm:$0xff]  }
  0x6c   : > { %v3185_v47 = vld [vmem:[%s3785_s28 + $0x8] sm:$0xff]   ;;  %v3966_v49 = vld [vmem:[%s4649_s2 + $0x84] ss:$16 sps:$4 sm:$0xff]   ;;  %v3976_v51 = vld [vmem:[%s4649_s2 + $0x80] ss:$16 sps:$4 sm:$0xff]   ;;  %p2283_p7 = scmp.lt.s32.totalorder %s2282_s18, 10 }
  0x6d   : > { %711 = vmatpush1.bf16.msra.mxu0 %v3128_v17  ;;  %764 = vmatpush1.bf16.msra.mxu1 %v3129_v18  ;;  %v3959_v48 = vld [vmem:[%s4649_s2 + $0xa8] ss:$16 sps:$4 sm:$0xff]   ;;  %v3971_v50 = vld [vmem:[%s4649_s2 + $0x8c] ss:$16 sps:$4 sm:$0xff]   ;;  %v3988_v53 = vld [vmem:[%s4649_s2 + $0x64] ss:$16 sps:$4 sm:$0xff]   ;;  %v1080_v18 = vlaneseq }
  0x6e   : > { %712 = vmatprep.subr.bf16.mxu0 %v3130_v19  ;;  %765 = vmatprep.subr.bf16.mxu1 %v3132_v20  ;;  %v3983_v52 = vld [vmem:[%s4649_s2 + $0x88] ss:$16 sps:$4 sm:$0xff]   ;;  %v3993_v54 = vld [vmem:[%s4649_s2 + $0x6c] ss:$16 sps:$4 sm:$0xff]   ;;  %v4000_v55 = vld [vmem:[%s4649_s2 + $0x60] ss:$16 sps:$4 sm:$0xff]  }
  0x6f   : > { %v4005_v56 = vld [vmem:[%s4649_s2 + $0x68] ss:$16 sps:$4 sm:$0xff]   ;;  %v4012_v57 = vld [vmem:[%s4649_s2 + $0x44] ss:$16 sps:$4 sm:$0xff]   ;;  %v4017_v58 = vld [vmem:[%s4649_s2 + $0x4c] ss:$16 sps:$4 sm:$0xff]  }
  0x70   : > { %v4026_v59 = vld [vmem:[%s4649_s2 + $0x40] ss:$16 sps:$4 sm:$0xff]   ;;  %v4031_v60 = vld [vmem:[%s4649_s2 + $0x48] ss:$16 sps:$4 sm:$0xff]   ;;  %v4036_v61 = vld [vmem:[%s4649_s2 + $0x24] ss:$16 sps:$4 sm:$0xff]  }
  0x71   : > { %713 = vmatpush1.bf16.msra.mxu0 %v3134_v21  ;;  %766 = vmatpush1.bf16.msra.mxu1 %v3135_v22  ;;  %v4041_v62 = vld [vmem:[%s4649_s2 + $0x2c] ss:$16 sps:$4 sm:$0xff]   ;;  %v4050_v63 = vld [vmem:[%s4649_s2 + $0x20] ss:$16 sps:$4 sm:$0xff]   ;;  %v4055_v0 = vld [vmem:[%s4649_s2 + $0x28] ss:$16 sps:$4 sm:$0xff]  }
  0x72   : > { %714 = vmatprep.subr.bf16.mxu0 %v3136_v23  ;;  %767 = vmatprep.subr.bf16.mxu1 %v3138_v24  ;;  %v4060_v1 = vld [vmem:[%s4649_s2 + $0x4] ss:$16 sps:$4 sm:$0xff]   ;;  %v4065_v2 = vld [vmem:[%s4649_s2 + $0xc] ss:$16 sps:$4 sm:$0xff]   ;;  %v4074_v3 = vld [vmem:[%s4649_s2] ss:$16 sps:$4 sm:$0xff]  }
  0x73   : > { %v4079_v5 = vld [vmem:[%s4649_s2 + $0x8] ss:$16 sps:$4 sm:$0xff]   ;;  %v826_v6 = vld [vmem:[#allocation4] sm:$0xff]  ;;  %v4139_v21 = vshrl.u32 %v1080_v18, 7  ;;  %s2134_s27 = scalar_select %p2132_p3, 1, 0 }
  0x74   : > { %v832_v7 = vpack.c.bf16 %v826_v6, %v826_v6  ;;  %s2285_s21 = scalar_select %p2283_p7, 1, 0  ;;  %vm2615_vm5 = vcmask 7168  }
  0x75   : > { %715 = vmatpush1.bf16.msra.mxu0 %v3140_v25  ;;  %768 = vmatpush1.bf16.msra.mxu1 %v3141_v26  ;;  %v4660_v24 = vsub.s32 0, %v4139_v21  ;;  %v493_v26 = vld [vmem:[#allocation11] sm:$0xf]  ;;  %s2433_s19 = sadd.s32 2, %s3778_s17  ;;  %s2584_s26 = sadd.s32 3, %s3778_s17 }
  0x76   : > { %716 = vmatprep.subr.bf16.mxu0 %v3142_v27  ;;  %769 = vmatprep.subr.bf16.mxu1 %v3144_v28  ;;  %v4661_v27 = vsub.s32 1, %v4139_v21  ;;  %p2434_p0 = scmp.lt.s32.totalorder %s2433_s19, 10  ;;  %p2585_p5 = scmp.lt.s32.totalorder %s2584_s26, 10 }
  0x77   : > { %p2994_p1 = scmp.ne.s32.totalorder %s3681_s16, 2 }
  0x78   : > { %s2436_s23 = scalar_select %p2434_p0, 1, 0 }
  0x79   : > { %717 = vmatpush1.bf16.msra.mxu0 %v3146_v29  ;;  %770 = vmatpush1.bf16.msra.mxu1 %v3147_v30  ;;  %v4153_v29 = vrot.slane %v493_v26, %v4660_v24  ;;  %v4663_v24 = vsub.s32 2, %v4139_v21  ;;  %s2587_s22 = scalar_select %p2585_p5, 1, 0 }
  0x7a   : > { %718 = vmatprep.subr.bf16.mxu0 %v3148_v31  ;;  %771 = vmatprep.subr.bf16.mxu1 %v3150_v32 }
  0x7d   : > { %719 = vmatpush1.bf16.msra.mxu0 %v3152_v33  ;;  %772 = vmatpush1.bf16.msra.mxu1 %v3153_v34  ;;  %v4157_v33 = vrot.slane %v493_v26, %v4661_v27  ;;  %v4164_v27 = vrot.slane %v493_v26, %v4663_v24 }
  0x7e   : > { %993 = vmatprep.subr.bf16.mxu0 %v3892_v35  ;;  %1034 = vmatprep.subr.bf16.mxu1 %v3897_v36 }
  0x80   : > { %737 = vmatmul.mubr.bf16.vlgmr.msra.gmra.mxu0 %v3154_v37  ;;  %790 = vmatmul.mubr.bf16.vlgmr.msra.gmra.mxu1 %v3154_v37 }
  0x81   : > { %994 = vmatpush1.bf16.msra.mxu0 %v3903_v38  ;;  %1035 = vmatpush1.bf16.msra.mxu1 %v3908_v39 }
  0x82   : > { %995 = vmatprep.subr.bf16.mxu0 %v3913_v40  ;;  %1036 = vmatprep.subr.bf16.mxu1 %v3920_v41 }
  0x83   : > { %746 = vmatprep.mubr.bf16.mxu0 %v4658_v4  ;;  %799 = vmatprep.mubr.bf16.mxu1 %v4658_v4 }
  0x85   : > { %996 = vmatpush1.bf16.msra.mxu0 %v3925_v42  ;;  %1037 = vmatpush1.bf16.msra.mxu1 %v3930_v43 }
  0x86   : > { %997 = vmatprep.subr.bf16.mxu0 %v3937_v44  ;;  %1038 = vmatprep.subr.bf16.mxu1 %v3944_v45 }
  0x88   : > { %747 = vmatmul.mubr.bf16.gmra.mxu0 %v3185_v47  ;;  %800 = vmatmul.mubr.bf16.gmra.mxu1 %v3185_v47 }
  0x89   : > { %998 = vmatpush1.bf16.msra.mxu0 %v3949_v46  ;;  %1039 = vmatpush1.bf16.msra.mxu1 %v3959_v48 }
  0x8a   : > { %999 = vmatprep.subr.bf16.mxu0 %v3966_v49  ;;  %1040 = vmatprep.subr.bf16.mxu1 %v3971_v50 }
  0x8b   : > { %1025 = vmatprep.mubr.bf16.mxu0 %v4658_v4  ;;  %1066 = vmatprep.mubr.bf16.mxu1 %v4658_v4 }
  0x8d   : > { %1000 = vmatpush1.bf16.msra.mxu0 %v3976_v51  ;;  %1041 = vmatpush1.bf16.msra.mxu1 %v3983_v52 }
  0x8e   : > { %1001 = vmatprep.subr.bf16.mxu0 %v3988_v53  ;;  %1042 = vmatprep.subr.bf16.mxu1 %v3993_v54 }
  0x91   : > { %1002 = vmatpush1.bf16.msra.mxu0 %v4000_v55  ;;  %1043 = vmatpush1.bf16.msra.mxu1 %v4005_v56 }
  0x92   : > { %1003 = vmatprep.subr.bf16.mxu0 %v4012_v57  ;;  %1044 = vmatprep.subr.bf16.mxu1 %v4017_v58 }
  0x95   : > { %1004 = vmatpush1.bf16.msra.mxu0 %v4026_v59  ;;  %1045 = vmatpush1.bf16.msra.mxu1 %v4031_v60 }
  0x96   : > { %1005 = vmatprep.subr.bf16.mxu0 %v4036_v61  ;;  %1046 = vmatprep.subr.bf16.mxu1 %v4041_v62 }
  0x99   : > { %1006 = vmatpush1.bf16.msra.mxu0 %v4050_v63  ;;  %1047 = vmatpush1.bf16.msra.mxu1 %v4055_v0 }
  0x9a   : > { %1007 = vmatprep.subr.bf16.mxu0 %v4060_v1  ;;  %1048 = vmatprep.subr.bf16.mxu1 %v4065_v2 }
  0x9d   : > { %1008 = vmatpush1.bf16.msra.mxu0 %v4074_v3  ;;  %1049 = vmatpush1.bf16.msra.mxu1 %v4079_v5 }
  0x9e   : > { %1135 = vmatprep.subr.bf16.mxu0 %v3892_v35  ;;  %1176 = vmatprep.subr.bf16.mxu1 %v3897_v36 }
  0xa0   : > { %1026 = vmatmul.mubr.bf16.vlgmr.msra.gmra.mxu0 %v832_v7  ;;  %1067 = vmatmul.mubr.bf16.vlgmr.msra.gmra.mxu1 %v832_v7 }
  0xa1   : > { %1136 = vmatpush1.bf16.msra.mxu0 %v3903_v38  ;;  %1177 = vmatpush1.bf16.msra.mxu1 %v3908_v39 }
  0xa2   : > { %1137 = vmatprep.subr.bf16.mxu0 %v3913_v40  ;;  %1178 = vmatprep.subr.bf16.mxu1 %v3920_v41 }
  0xa3   : > { %1167 = vmatprep.mubr.bf16.mxu0 %v4658_v4  ;;  %1208 = vmatprep.mubr.bf16.mxu1 %v4658_v4 }
  0xa5   : > { %1138 = vmatpush1.bf16.msra.mxu0 %v3925_v42  ;;  %1179 = vmatpush1.bf16.msra.mxu1 %v3930_v43 }
  0xa6   : > { %1139 = vmatprep.subr.bf16.mxu0 %v3937_v44  ;;  %1180 = vmatprep.subr.bf16.mxu1 %v3944_v45 }
  0xa9   : > { %1140 = vmatpush1.bf16.msra.mxu0 %v3949_v46  ;;  %1181 = vmatpush1.bf16.msra.mxu1 %v3959_v48 }
  0xaa   : > { %1141 = vmatprep.subr.bf16.mxu0 %v3966_v49  ;;  %1182 = vmatprep.subr.bf16.mxu1 %v3971_v50 }
  0xad   : > { %1142 = vmatpush1.bf16.msra.mxu0 %v3976_v51  ;;  %1183 = vmatpush1.bf16.msra.mxu1 %v3983_v52 }
  0xae   : > { %1143 = vmatprep.subr.bf16.mxu0 %v3988_v53  ;;  %1184 = vmatprep.subr.bf16.mxu1 %v3993_v54 }
  0xb1   : > { %1144 = vmatpush1.bf16.msra.mxu0 %v4000_v55  ;;  %1185 = vmatpush1.bf16.msra.mxu1 %v4005_v56 }
  0xb2   : > { %1145 = vmatprep.subr.bf16.mxu0 %v4012_v57  ;;  %1186 = vmatprep.subr.bf16.mxu1 %v4017_v58 }
  0xb5   : > { %1146 = vmatpush1.bf16.msra.mxu0 %v4026_v59  ;;  %1187 = vmatpush1.bf16.msra.mxu1 %v4031_v60 }
  0xb6   : > { %1147 = vmatprep.subr.bf16.mxu0 %v4036_v61  ;;  %1188 = vmatprep.subr.bf16.mxu1 %v4041_v62 }
  0xb9   : > { %1148 = vmatpush1.bf16.msra.mxu0 %v4050_v63  ;;  %1189 = vmatpush1.bf16.msra.mxu1 %v4055_v0 }
  0xba   : > { %1149 = vmatprep.subr.bf16.mxu0 %v4060_v1  ;;  %1190 = vmatprep.subr.bf16.mxu1 %v4065_v2 }
  0xbd   : > { %1150 = vmatpush1.bf16.msra.mxu0 %v4074_v3  ;;  %1191 = vmatpush1.bf16.msra.mxu1 %v4079_v5 }
  0xbe   : > { %1257 = vmatprep.subr.bf16.mxu0 %v3892_v35  ;;  %1298 = vmatprep.subr.bf16.mxu1 %v3897_v36 }
 0x140   : > { %v791_v8 = vpop.f32.mrf.mxu1  ;;  %v738_v9 = vpop.f32.mrf.mxu0 }
 0x142   : > { %v793_v10 = vpop.f32.mrf.mxu1  ;;  %v740_v11 = vpop.f32.mrf.mxu0 }
 0x144   : > { %v4123_v12 = vpop.f32.mrf.mxu1  ;;  %v4125_v13 = vpop.f32.mrf.mxu0 }
 0x146   : > { %v4127_v14 = vpop.f32.mrf.mxu1  ;;  %v4129_v15 = vpop.f32.mrf.mxu0 }
 0x148   : > { %v4131_v16 = vpop.f32.mrf.mxu1  ;;  %v4133_v17 = vpop.f32.mrf.mxu0 }
 0x14a   : > { %v4135_v19 = vpop.f32.mrf.mxu1  ;;  %v4137_v20 = vpop.f32.mrf.mxu0 }
 0x14c   : > { %v4141_v22 = vpop.f32.mrf.mxu1  ;;  %v4143_v23 = vpop.f32.mrf.mxu0 }
 0x14d   : > { %4668 = vst [vmem:[#allocation22_spill] sm:$0xff] %v4141_v22 }
 0x14e   : > { %v4146_v25 = vpop.f32.mrf.mxu1  ;;  %v4149_v28 = vpop.f32.mrf.mxu0 }
 0x14f   : > { %4669 = vst [vmem:[#allocation23_spill] sm:$0xff] %v4146_v25  ;;  %4670 = vst [vmem:[#allocation24_spill] sm:$0xff] %v4149_v28 }
 0x160   : > { %v1027_v30 = vpop.f32.mrf.mxu0  ;;  %v1068_v31 = vpop.f32.mrf.mxu1 }
 0x161   : > { %v1075_v32 = vadd.f32 %v1027_v30, %v738_v9  ;;  %v1077_v30 = vadd.f32 %v1068_v31, %v791_v8 }
 0x162   : > { %v1029_v34 = vpop.f32.mrf.mxu0  ;;  %v1070_v37 = vpop.f32.mrf.mxu1 }
 0x163   : > { %v1100_v47 = vadd.f32 %v4153_v29, %v1075_v32  ;;  %v1076_v6 = vadd.f32 %v1029_v34, %v740_v11  ;;  %v4662_v32 = vsub.s32 3, %v4139_v21  ;;  %v1102_v11 = vadd.f32 %v4164_v27, %v1077_v30 }
 0x164   : > { %v1031_v7 = vpop.f32.mrf.mxu0  ;;  %v1072_v18 = vpop.f32.mrf.mxu1  ;;  %v1078_v34 = vadd.f32 %v1070_v37, %v793_v10 }
 0x165   : > { %v2904_v4 = vmul.f32 -1.442695, %v1100_v47  ;;  %v1101_v25 = vadd.f32 %v4157_v33, %v1076_v6  ;;  %v4170_v47 = vrot.slane %v493_v26, %v4662_v32  ;;  %v2906_v6 = vmul.f32 -1.442695, %v1102_v11  ;;  %v827_v18 = vld [vmem:[#allocation5] sm:$0xff] }
 0x166   : > { %v1032_v22 = vpop.f32.mrf.mxu0  ;;  %v1073_v28 = vpop.f32.mrf.mxu1 }
 0x167   : > { %3300 = vpow2.f32 %v2904_v4  ;;  %v2905_v9 = vmul.f32 -1.442695, %v1101_v25  ;;  %v1103_v4 = vadd.f32 %v4170_v47, %v1078_v34 }
 0x169   : > { %3302 = vpow2.f32 %v2905_v9 }
 0x16a   : > { %3304 = vpow2.f32 %v2906_v6 }
 0x174   : > { %v3301_v22 = vpop.eup %3300 }
 0x175   : > { %v1113_v25 = vadd.f32 1.0, %v3301_v22 }
 0x176   : > { %v3303_v28 = vpop.eup %3302 }
 0x177   : > { %3306 = vrcp.f32 %v1113_v25  ;;  %v1114_v8 = vadd.f32 1.0, %v3303_v28  ;;  %v3305_v31 = vpop.eup %3304 }
 0x178   : > { %3308 = vtanh.f32 %v1103_v4  ;;  %v1115_v37 = vadd.f32 1.0, %v3305_v31  ;;  %v4671_v4 = vmov 0  }
 0x179   : > { %3310 = vrcp.f32 %v1114_v8 }
 0x17a   : > { %3312 = vrcp.f32 %v1115_v37 }
 0x184   : > { %v3307_v7 = vpop.eup %3306 }
 0x185   : > { %v3309_v9 = vpop.eup %3308 }
 0x186   : > { %v3311_v10 = vpop.eup %3310  ;;  %v1124_v26 = vmul.f32 %v3309_v9, %v3307_v7 }
 0x187   : > { %v1123_v30 = vmul.f32 %v3311_v10, %v827_v18  ;;  %v3313_v11 = vpop.eup %3312 }
 0x189   : > { %v4173_v32 = vadd.f32 %v1124_v26, %v1123_v30 }
 0x18b   : > { %3314 = vtanh.f32 %v4173_v32 }
 0x198   : > { %v3315_v34 = vpop.eup %3314 }
 0x199   : > { %v4176_v6 = vmul.f32 %v3315_v34, %v3313_v11 }
 0x19b   : > { %v1134_v22 = vpack.c.bf16 %v4176_v6, %v4176_v6 }
 0x19d   : > { %1168 = vmatmul.mubr.bf16.vlgmr.msra.gmra.mxu0 %v1134_v22  ;;  %1209 = vmatmul.mubr.bf16.vlgmr.msra.gmra.mxu1 %v1134_v22 }
 0x19e   : > { %1258 = vmatpush1.bf16.msra.mxu0 %v3903_v38  ;;  %1299 = vmatpush1.bf16.msra.mxu1 %v3908_v39 }
 0x19f   : > { %1259 = vmatprep.subr.bf16.mxu0 %v3913_v40  ;;  %1300 = vmatprep.subr.bf16.mxu1 %v3920_v41 }
 0x1a0   : > { %1289 = vmatprep.mubr.bf16.mxu0 %v4671_v4  ;;  %1330 = vmatprep.mubr.bf16.mxu1 %v4671_v4 }
 0x1a2   : > { %1260 = vmatpush1.bf16.msra.mxu0 %v3925_v42  ;;  %1301 = vmatpush1.bf16.msra.mxu1 %v3930_v43 }
 0x1a3   : > { %1261 = vmatprep.subr.bf16.mxu0 %v3937_v44  ;;  %1302 = vmatprep.subr.bf16.mxu1 %v3944_v45 }
 0x1a6   : > { %1262 = vmatpush1.bf16.msra.mxu0 %v3949_v46  ;;  %1303 = vmatpush1.bf16.msra.mxu1 %v3959_v48 }
 0x1a7   : > { %1263 = vmatprep.subr.bf16.mxu0 %v3966_v49  ;;  %1304 = vmatprep.subr.bf16.mxu1 %v3971_v50 }
 0x1aa   : > { %1264 = vmatpush1.bf16.msra.mxu0 %v3976_v51  ;;  %1305 = vmatpush1.bf16.msra.mxu1 %v3983_v52 }
 0x1ab   : > { %1265 = vmatprep.subr.bf16.mxu0 %v3988_v53  ;;  %1306 = vmatprep.subr.bf16.mxu1 %v3993_v54 }
 0x1ae   : > { %1266 = vmatpush1.bf16.msra.mxu0 %v4000_v55  ;;  %1307 = vmatpush1.bf16.msra.mxu1 %v4005_v56 }
 0x1af   : > { %1267 = vmatprep.subr.bf16.mxu0 %v4012_v57  ;;  %1308 = vmatprep.subr.bf16.mxu1 %v4017_v58 }
 0x1b2   : > { %1268 = vmatpush1.bf16.msra.mxu0 %v4026_v59  ;;  %1309 = vmatpush1.bf16.msra.mxu1 %v4031_v60 }
 0x1b3   : > { %1269 = vmatprep.subr.bf16.mxu0 %v4036_v61  ;;  %1310 = vmatprep.subr.bf16.mxu1 %v4041_v62 }
 0x1b6   : > { %1270 = vmatpush1.bf16.msra.mxu0 %v4050_v63  ;;  %1311 = vmatpush1.bf16.msra.mxu1 %v4055_v0 }
 0x1b7   : > { %1271 = vmatprep.subr.bf16.mxu0 %v4060_v1  ;;  %1312 = vmatprep.subr.bf16.mxu1 %v4065_v2 }
 0x1ba   : > { %1272 = vmatpush1.bf16.msra.mxu0 %v4074_v3  ;;  %1313 = vmatpush1.bf16.msra.mxu1 %v4079_v5 }
 0x1bb   : > { %1379 = vmatprep.subr.bf16.mxu0 %v3892_v35  ;;  %1420 = vmatprep.subr.bf16.mxu1 %v3897_v36 }
 0x25d   : > { %v1169_v25 = vpop.f32.mrf.mxu0  ;;  %v1210_v28 = vpop.f32.mrf.mxu1 }
 0x25e   : > { %v1217_v8 = vadd.f32 %v1169_v25, %v4125_v13  ;;  %v1219_v36 = vadd.f32 %v1210_v28, %v4123_v12 }
 0x25f   : > { %v1171_v31 = vpop.f32.mrf.mxu0  ;;  %v1212_v7 = vpop.f32.mrf.mxu1 }
 0x260   : > { %v1221_v18 = vadd.f32 %v1217_v8, %v4153_v29  ;;  %v1218_v9 = vadd.f32 %v1171_v31, %v4129_v15  ;;  %v1223_v13 = vadd.f32 %v1219_v36, %v4164_v27  ;;  %v1220_v22 = vadd.f32 %v1212_v7, %v4127_v14 }
 0x261   : > { %v1173_v10 = vpop.f32.mrf.mxu0  ;;  %v1214_v37 = vpop.f32.mrf.mxu1 }
 0x262   : > { %v2907_v30 = vmul.f32 -1.442695, %v1221_v18  ;;  %v1222_v26 = vadd.f32 %v1218_v9, %v4157_v33  ;;  %v2909_v25 = vmul.f32 -1.442695, %v1223_v13  ;;  %v1224_v15 = vadd.f32 %v1220_v22, %v4170_v47  ;;  %v3204_v22 = vld [vmem:[#allocation13 + $0xe0] ss:$16 sps:$4 sm:$0xff]  }
 0x263   : > { %v1174_v11 = vpop.f32.mrf.mxu0  ;;  %v1215_v34 = vpop.f32.mrf.mxu1 }
 0x264   : > { %3316 = vpow2.f32 %v2907_v30  ;;  %v2908_v35 = vmul.f32 -1.442695, %v1222_v26 }
 0x266   : > { %3318 = vpow2.f32 %v2908_v35 }
 0x267   : > { %3320 = vpow2.f32 %v2909_v25  ;;  %v3207_v25 = vld [vmem:[#allocation13 + $0xe8] ss:$16 sps:$4 sm:$0xff]  }
 0x271   : > { %v3317_v8 = vpop.eup %3316 }
 0x272   : > { %v1234_v31 = vadd.f32 1.0, %v3317_v8 }
 0x273   : > { %v3319_v10 = vpop.eup %3318 }
 0x274   : > { %3322 = vrcp.f32 %v1234_v31  ;;  %v1235_v18 = vadd.f32 1.0, %v3319_v10  ;;  %v3321_v9 = vpop.eup %3320  ;;  %v3215_v31 = vld [vmem:[#allocation13 + $0xcc] ss:$16 sps:$4 sm:$0xff]   ;;  %v3210_v10 = vld [vmem:[#allocation13 + $0xc0] ss:$16 sps:$4 sm:$0xff]  }
 0x275   : > { %3324 = vtanh.f32 %v1224_v15  ;;  %v1236_v12 = vadd.f32 1.0, %v3321_v9  ;;  %v3212_v15 = vld [vmem:[#allocation13 + $0xc4] ss:$16 sps:$4 sm:$0xff]  }
 0x276   : > { %3326 = vrcp.f32 %v1235_v18  ;;  %v3213_v18 = vld [vmem:[#allocation13 + $0xc8] ss:$16 sps:$4 sm:$0xff]   ;;  %v3218_v9 = vld [vmem:[#allocation13 + $0xa4] ss:$16 sps:$4 sm:$0xff]  }
 0x277   : > { %3328 = vrcp.f32 %v1236_v12  ;;  %v3224_v12 = vld [vmem:[#allocation13 + $0x84] ss:$16 sps:$4 sm:$0xff]  }
 0x281   : > { %v3323_v37 = vpop.eup %3322 }
 0x282   : > { %v3325_v30 = vpop.eup %3324 }
 0x283   : > { %v3327_v26 = vpop.eup %3326  ;;  %v1245_v11 = vmul.f32 %v3325_v30, %v3323_v37  ;;  %v3221_v37 = vld [vmem:[#allocation13 + $0xac] ss:$16 sps:$4 sm:$0xff]   ;;  %v3216_v30 = vld [vmem:[#allocation13 + $0xa0] ss:$16 sps:$4 sm:$0xff]  }
 0x284   : > { %v1244_v28 = vmul.f32 %v3327_v26, %v4173_v32  ;;  %v3329_v7 = vpop.eup %3328  ;;  %v3219_v26 = vld [vmem:[#allocation13 + $0xa8] ss:$16 sps:$4 sm:$0xff]  }
 0x286   : > { %v4223_v14 = vadd.f32 %v1245_v11, %v1244_v28  ;;  %v3227_v28 = vld [vmem:[#allocation13 + $0x8c] ss:$16 sps:$4 sm:$0xff]   ;;  %v3222_v11 = vld [vmem:[#allocation13 + $0x80] ss:$16 sps:$4 sm:$0xff]  }
 0x288   : > { %3330 = vtanh.f32 %v4223_v14 }
 0x295   : > { %v3331_v34 = vpop.eup %3330 }
 0x296   : > { %v4226_v35 = vmul.f32 %v3331_v34, %v3329_v7  ;;  %v3230_v7 = vld [vmem:[#allocation13 + $0x64] ss:$16 sps:$4 sm:$0xff]   ;;  %v3233_v34 = vld [vmem:[#allocation13 + $0x6c] ss:$16 sps:$4 sm:$0xff]  }
 0x298   : > { %v1256_v36 = vpack.c.bf16 %v4226_v35, %v4226_v35 }
 0x29a   : > { %1290 = vmatmul.mubr.bf16.vlgmr.msra.gmra.mxu0 %v1256_v36  ;;  %1331 = vmatmul.mubr.bf16.vlgmr.msra.gmra.mxu1 %v1256_v36  ;;  %v3228_v36 = vld [vmem:[#allocation13 + $0x60] ss:$16 sps:$4 sm:$0xff]  }
 0x29b   : > { %1380 = vmatpush1.bf16.msra.mxu0 %v3903_v38  ;;  %1421 = vmatpush1.bf16.msra.mxu1 %v3908_v39  ;;  %v3206_v38 = vld [vmem:[#allocation13 + $0xe4] ss:$16 sps:$4 sm:$0xff]   ;;  %v3209_v39 = vld [vmem:[#allocation13 + $0xec] ss:$16 sps:$4 sm:$0xff]  }
 0x29c   : > { %1381 = vmatprep.subr.bf16.mxu0 %v3913_v40  ;;  %1422 = vmatprep.subr.bf16.mxu1 %v3920_v41 }
 0x29d   : > { %1411 = vmatprep.mubr.bf16.mxu0 %v4671_v4  ;;  %1452 = vmatprep.mubr.bf16.mxu1 %v4671_v4 }
 0x29f   : > { %1382 = vmatpush1.bf16.msra.mxu0 %v3925_v42  ;;  %1423 = vmatpush1.bf16.msra.mxu1 %v3930_v43 }
 0x2a0   : > { %1383 = vmatprep.subr.bf16.mxu0 %v3937_v44  ;;  %1424 = vmatprep.subr.bf16.mxu1 %v3944_v45 }
 0x2a3   : > { %1384 = vmatpush1.bf16.msra.mxu0 %v3949_v46  ;;  %1425 = vmatpush1.bf16.msra.mxu1 %v3959_v48 }
 0x2a4   : > { %1385 = vmatprep.subr.bf16.mxu0 %v3966_v49  ;;  %1426 = vmatprep.subr.bf16.mxu1 %v3971_v50 }
 0x2a7   : > { %1386 = vmatpush1.bf16.msra.mxu0 %v3976_v51  ;;  %1427 = vmatpush1.bf16.msra.mxu1 %v3983_v52 }
 0x2a8   : > { %1387 = vmatprep.subr.bf16.mxu0 %v3988_v53  ;;  %1428 = vmatprep.subr.bf16.mxu1 %v3993_v54 }
 0x2ab   : > { %1388 = vmatpush1.bf16.msra.mxu0 %v4000_v55  ;;  %1429 = vmatpush1.bf16.msra.mxu1 %v4005_v56 }
 0x2ac   : > { %1389 = vmatprep.subr.bf16.mxu0 %v4012_v57  ;;  %1430 = vmatprep.subr.bf16.mxu1 %v4017_v58 }
 0x2af   : > { %1390 = vmatpush1.bf16.msra.mxu0 %v4026_v59  ;;  %1431 = vmatpush1.bf16.msra.mxu1 %v4031_v60 }
 0x2b0   : > { %1391 = vmatprep.subr.bf16.mxu0 %v4036_v61  ;;  %1432 = vmatprep.subr.bf16.mxu1 %v4041_v62 }
 0x2b3   : > { %1392 = vmatpush1.bf16.msra.mxu0 %v4050_v63  ;;  %1433 = vmatpush1.bf16.msra.mxu1 %v4055_v0 }
 0x2b4   : > { %1393 = vmatprep.subr.bf16.mxu0 %v4060_v1  ;;  %1434 = vmatprep.subr.bf16.mxu1 %v4065_v2 }
 0x2b7   : > { %1394 = vmatpush1.bf16.msra.mxu0 %v4074_v3  ;;  %1435 = vmatpush1.bf16.msra.mxu1 %v4079_v5 }
 0x2b8   : > { %1695 = vmatprep.subr.bf16.mxu0 %v3206_v38  ;;  %1748 = vmatprep.subr.bf16.mxu1 %v3209_v39  ;;  %v3231_v38 = vld [vmem:[#allocation13 + $0x68] ss:$16 sps:$4 sm:$0xff]   ;;  %v3236_v39 = vld [vmem:[#allocation13 + $0x44] ss:$16 sps:$4 sm:$0xff]  }
 0x35a   : > { %v1291_v40 = vpop.f32.mrf.mxu0  ;;  %v1332_v41 = vpop.f32.mrf.mxu1 }
 0x35b   : > { %v1339_v42 = vadd.f32 %v1291_v40, %v4133_v17  ;;  %v1341_v55 = vadd.f32 %v1332_v41, %v4131_v16  ;;  %v3239_v40 = vld [vmem:[#allocation13 + $0x4c] ss:$16 sps:$4 sm:$0xff]   ;;  %v3234_v41 = vld [vmem:[#allocation13 + $0x40] ss:$16 sps:$4 sm:$0xff]  }
 0x35c   : > { %v1293_v43 = vpop.f32.mrf.mxu0  ;;  %v1334_v44 = vpop.f32.mrf.mxu1 }
 0x35d   : > { %v1343_v45 = vadd.f32 %v1339_v42, %v4153_v29  ;;  %v1340_v46 = vadd.f32 %v1293_v43, %v4137_v20  ;;  %v1345_v56 = vadd.f32 %v1341_v55, %v4164_v27  ;;  %v1342_v57 = vadd.f32 %v1334_v44, %v4135_v19  ;;  %v3237_v42 = vld [vmem:[#allocation13 + $0x48] ss:$16 sps:$4 sm:$0xff]   ;;  %v3242_v43 = vld [vmem:[#allocation13 + $0x24] ss:$16 sps:$4 sm:$0xff]   ;;  %v3245_v44 = vld [vmem:[#allocation13 + $0x2c] ss:$16 sps:$4 sm:$0xff]  }
 0x35e   : > { %v1295_v48 = vpop.f32.mrf.mxu0  ;;  %v1336_v49 = vpop.f32.mrf.mxu1  ;;  %v4288_v55 = vld [vmem:[#allocation15 + $0xe0] ss:$16 sps:$4 sm:$0xff]  }
 0x35f   : > { %v2910_v50 = vmul.f32 -1.442695, %v1343_v45  ;;  %v1344_v51 = vadd.f32 %v1340_v46, %v4157_v33  ;;  %v2912_v58 = vmul.f32 -1.442695, %v1345_v56  ;;  %v1346_v60 = vadd.f32 %v1342_v57, %v4170_v47  ;;  %v3240_v45 = vld [vmem:[#allocation13 + $0x20] ss:$16 sps:$4 sm:$0xff]  }
 0x360   : > { %v1296_v52 = vpop.f32.mrf.mxu0  ;;  %v1337_v53 = vpop.f32.mrf.mxu1  ;;  %v3243_v46 = vld [vmem:[#allocation13 + $0x28] ss:$16 sps:$4 sm:$0xff]   ;;  %v3248_v48 = vld [vmem:[#allocation13 + $0x4] ss:$16 sps:$4 sm:$0xff]   ;;  %v3251_v49 = vld [vmem:[#allocation13 + $0xc] ss:$16 sps:$4 sm:$0xff]  }
 0x361   : > { %3332 = vpow2.f32 %v2910_v50  ;;  %v2911_v54 = vmul.f32 -1.442695, %v1344_v51  ;;  %v3246_v50 = vld [vmem:[#allocation13] ss:$16 sps:$4 sm:$0xff]   ;;  %v3249_v51 = vld [vmem:[#allocation13 + $0x8] ss:$16 sps:$4 sm:$0xff]   ;;  %v1501_v52 = vpack.c.bf16 %v4226_v35, %v4176_v6 }
 0x362   : > { %v4284_v53 = vld [vmem:[#allocation15 + $0xe4] ss:$16 sps:$4 sm:$0xff]   ;;  %v4290_v56 = vld [vmem:[#allocation15 + $0xe8] ss:$16 sps:$4 sm:$0xff]   ;;  %v4298_v35 = vld [vmem:[#allocation15 + $0xcc] ss:$16 sps:$4 sm:$0xff]  }
 0x363   : > { %3334 = vpow2.f32 %v2911_v54  ;;  %v4286_v54 = vld [vmem:[#allocation15 + $0xec] ss:$16 sps:$4 sm:$0xff]   ;;  %v4296_v6 = vld [vmem:[#allocation15 + $0xc4] ss:$16 sps:$4 sm:$0xff]   ;;  %v4300_v57 = vld [vmem:[#allocation15 + $0xc0] ss:$16 sps:$4 sm:$0xff]  }
 0x364   : > { %3336 = vpow2.f32 %v2912_v58  ;;  %v4302_v58 = vld [vmem:[#allocation15 + $0xc8] ss:$16 sps:$4 sm:$0xff]  }
 0x36e   : > { %v3333_v59 = vpop.eup %3332 }
 0x36f   : > { %v1356_v61 = vadd.f32 1.0, %v3333_v59  ;;  %v4304_v59 = vld [vmem:[#allocation15 + $0xa4] ss:$16 sps:$4 sm:$0xff]  }
 0x370   : > { %v3335_v62 = vpop.eup %3334 }
 0x371   : > { %3338 = vrcp.f32 %v1356_v61  ;;  %v1357_v63 = vadd.f32 1.0, %v3335_v62  ;;  %v3337_v0 = vpop.eup %3336  ;;  %v4312_v61 = vld [vmem:[#allocation15 + $0xa0] ss:$16 sps:$4 sm:$0xff]   ;;  %v4314_v62 = vld [vmem:[#allocation15 + $0xa8] ss:$16 sps:$4 sm:$0xff]  }
 0x372   : > { %3340 = vtanh.f32 %v1346_v60  ;;  %v1358_v5 = vadd.f32 1.0, %v3337_v0  ;;  %v4308_v60 = vld [vmem:[#allocation15 + $0xac] ss:$16 sps:$4 sm:$0xff]  }
 0x373   : > { %3342 = vrcp.f32 %v1357_v63  ;;  %v4318_v63 = vld [vmem:[#allocation15 + $0x84] ss:$16 sps:$4 sm:$0xff]   ;;  %v4320_v0 = vld [vmem:[#allocation15 + $0x8c] ss:$16 sps:$4 sm:$0xff]  }
 0x374   : > { %3344 = vrcp.f32 %v1358_v5  ;;  %v4332_v5 = vld [vmem:[#allocation15 + $0x6c] ss:$16 sps:$4 sm:$0xff]  }
 0x37e   : > { %v3339_v1 = vpop.eup %3338 }
 0x37f   : > { %v3341_v2 = vpop.eup %3340 }
 0x380   : > { %v3343_v3 = vpop.eup %3342  ;;  %v1367_v17 = vmul.f32 %v3341_v2, %v3339_v1  ;;  %v4324_v1 = vld [vmem:[#allocation15 + $0x80] ss:$16 sps:$4 sm:$0xff]   ;;  %v4326_v2 = vld [vmem:[#allocation15 + $0x88] ss:$16 sps:$4 sm:$0xff]  }
 0x381   : > { %v1366_v16 = vmul.f32 %v3343_v3, %v4223_v14  ;;  %v3345_v20 = vpop.eup %3344  ;;  %v3225_v14 = vld [vmem:[#allocation13 + $0x88] ss:$16 sps:$4 sm:$0xff]   ;;  %v4330_v3 = vld [vmem:[#allocation15 + $0x64] ss:$16 sps:$4 sm:$0xff]  }
 0x383   : > { %v4271_v19 = vadd.f32 %v1367_v17, %v1366_v16  ;;  %v4336_v16 = vld [vmem:[#allocation15 + $0x60] ss:$16 sps:$4 sm:$0xff]   ;;  %v4338_v17 = vld [vmem:[#allocation15 + $0x68] ss:$16 sps:$4 sm:$0xff]  }
 0x385   : > { %3346 = vtanh.f32 %v4271_v19 }
 0x392   : > { %v3347_v32 = vpop.eup %3346 }
 0x393   : > { %v4274_v13 = vmul.f32 %v3347_v32, %v3345_v20  ;;  %v4342_v20 = vld [vmem:[#allocation15 + $0x44] ss:$16 sps:$4 sm:$0xff]   ;;  %v4344_v32 = vld [vmem:[#allocation15 + $0x4c] ss:$16 sps:$4 sm:$0xff]  }
 0x395   : > { %v1378_v8 = vpack.c.bf16 %v4274_v13, %v4274_v13 }
 0x397   : > { %1412 = vmatmul.mubr.bf16.vlgmr.msra.gmra.mxu0 %v1378_v8  ;;  %1453 = vmatmul.mubr.bf16.vlgmr.msra.gmra.mxu1 %v1378_v8  ;;  %v4356_v8 = vld [vmem:[#allocation15 + $0x24] ss:$16 sps:$4 sm:$0xff]  }
 0x398   : > { %1696 = vmatpush1.bf16.msra.mxu0 %v3204_v22  ;;  %1749 = vmatpush1.bf16.msra.mxu1 %v3207_v25  ;;  %v4348_v22 = vld [vmem:[#allocation15 + $0x40] ss:$16 sps:$4 sm:$0xff]   ;;  %v4350_v25 = vld [vmem:[#allocation15 + $0x48] ss:$16 sps:$4 sm:$0xff]  }
 0x399   : > { %1697 = vmatprep.subr.bf16.mxu0 %v3212_v15  ;;  %1750 = vmatprep.subr.bf16.mxu1 %v3215_v31  ;;  %v4358_v15 = vld [vmem:[#allocation15 + $0x2c] ss:$16 sps:$4 sm:$0xff]   ;;  %v4360_v31 = vld [vmem:[#allocation15 + $0x20] ss:$16 sps:$4 sm:$0xff]  }
 0x39a   : > { %1727 = vmatprep.mubr.bf16.mxu0 %v4671_v4  ;;  %1780 = vmatprep.mubr.bf16.mxu1 %v4671_v4 }
 0x39c   : > { %1698 = vmatpush1.bf16.msra.mxu0 %v3210_v10  ;;  %1751 = vmatpush1.bf16.msra.mxu1 %v3213_v18  ;;  %v4362_v10 = vld [vmem:[#allocation15 + $0x28] ss:$16 sps:$4 sm:$0xff]   ;;  %v4364_v18 = vld [vmem:[#allocation15 + $0x4] ss:$16 sps:$4 sm:$0xff]  }
 0x39d   : > { %1699 = vmatprep.subr.bf16.mxu0 %v3218_v9  ;;  %1752 = vmatprep.subr.bf16.mxu1 %v3221_v37  ;;  %v4366_v9 = vld [vmem:[#allocation15 + $0xc] ss:$16 sps:$4 sm:$0xff]   ;;  %v4372_v37 = vld [vmem:[#allocation15] ss:$16 sps:$4 sm:$0xff]  }
 0x3a0   : > { %1700 = vmatpush1.bf16.msra.mxu0 %v3216_v30  ;;  %1753 = vmatpush1.bf16.msra.mxu1 %v3219_v26  ;;  %v4374_v30 = vld [vmem:[#allocation15 + $0x8] ss:$16 sps:$4 sm:$0xff]  }
 0x3a1   : > { %1701 = vmatprep.subr.bf16.mxu0 %v3224_v12  ;;  %1754 = vmatprep.subr.bf16.mxu1 %v3227_v28 }
 0x3a4   : > { %1702 = vmatpush1.bf16.msra.mxu0 %v3222_v11  ;;  %1755 = vmatpush1.bf16.msra.mxu1 %v3225_v14 }
 0x3a5   : > { %1703 = vmatprep.subr.bf16.mxu0 %v3230_v7  ;;  %1756 = vmatprep.subr.bf16.mxu1 %v3233_v34  ;;  %v4672_v34 = vld [vmem:[#allocation24_spill] sm:$0xff] }
 0x3a8   : > { %1704 = vmatpush1.bf16.msra.mxu0 %v3228_v36  ;;  %1757 = vmatpush1.bf16.msra.mxu1 %v3231_v38 }
 0x3a9   : > { %1705 = vmatprep.subr.bf16.mxu0 %v3236_v39  ;;  %1758 = vmatprep.subr.bf16.mxu1 %v3239_v40 }
 0x3ac   : > { %1706 = vmatpush1.bf16.msra.mxu0 %v3234_v41  ;;  %1759 = vmatpush1.bf16.msra.mxu1 %v3237_v42 }
 0x3ad   : > { %1707 = vmatprep.subr.bf16.mxu0 %v3242_v43  ;;  %1760 = vmatprep.subr.bf16.mxu1 %v3245_v44 }
 0x3b0   : > { %1708 = vmatpush1.bf16.msra.mxu0 %v3240_v45  ;;  %1761 = vmatpush1.bf16.msra.mxu1 %v3243_v46  ;;  %v4673_v45 = vld [vmem:[#allocation22_spill] sm:$0xff] }
 0x3b1   : > { %1709 = vmatprep.subr.bf16.mxu0 %v3248_v48  ;;  %1762 = vmatprep.subr.bf16.mxu1 %v3251_v49  ;;  %v4674_v48 = vld [vmem:[#allocation23_spill] sm:$0xff] }
 0x3b4   : > { %1710 = vmatpush1.bf16.msra.mxu0 %v3246_v50  ;;  %1763 = vmatpush1.bf16.msra.mxu1 %v3249_v51 }
 0x3b5   : > { %1987 = vmatprep.subr.bf16.mxu0 %v4284_v53  ;;  %2028 = vmatprep.subr.bf16.mxu1 %v4286_v54 }
 0x3b7   : > { %1728 = vmatmul.mubr.bf16.vlgmr.msra.gmra.mxu0 %v1501_v52  ;;  %1781 = vmatmul.mubr.bf16.vlgmr.msra.gmra.mxu1 %v1501_v52 }
 0x3b8   : > { %1737 = vmatprep.mubr.bf16.mxu0 %v4671_v4  ;;  %1790 = vmatprep.mubr.bf16.mxu1 %v4671_v4 }
 0x3b9   : > { %1988 = vmatpush1.bf16.msra.mxu0 %v4288_v55  ;;  %2029 = vmatpush1.bf16.msra.mxu1 %v4290_v56 }
 0x3ba   : > { %1989 = vmatprep.subr.bf16.mxu0 %v4296_v6  ;;  %2030 = vmatprep.subr.bf16.mxu1 %v4298_v35 }
 0x3bd   : > { %1990 = vmatpush1.bf16.msra.mxu0 %v4300_v57  ;;  %2031 = vmatpush1.bf16.msra.mxu1 %v4302_v58 }
 0x3be   : > { %1991 = vmatprep.subr.bf16.mxu0 %v4304_v59  ;;  %2032 = vmatprep.subr.bf16.mxu1 %v4308_v60 }
 0x3c1   : > { %1992 = vmatpush1.bf16.msra.mxu0 %v4312_v61  ;;  %2033 = vmatpush1.bf16.msra.mxu1 %v4314_v62 }
 0x3c2   : > { %1993 = vmatprep.subr.bf16.mxu0 %v4318_v63  ;;  %2034 = vmatprep.subr.bf16.mxu1 %v4320_v0 }
 0x3c5   : > { %1994 = vmatpush1.bf16.msra.mxu0 %v4324_v1  ;;  %2035 = vmatpush1.bf16.msra.mxu1 %v4326_v2 }
 0x3c6   : > { %1995 = vmatprep.subr.bf16.mxu0 %v4330_v3  ;;  %2036 = vmatprep.subr.bf16.mxu1 %v4332_v5 }
 0x3c9   : > { %1996 = vmatpush1.bf16.msra.mxu0 %v4336_v16  ;;  %2037 = vmatpush1.bf16.msra.mxu1 %v4338_v17 }
 0x3ca   : > { %1997 = vmatprep.subr.bf16.mxu0 %v4342_v20  ;;  %2038 = vmatprep.subr.bf16.mxu1 %v4344_v32 }
 0x3cd   : > { %1998 = vmatpush1.bf16.msra.mxu0 %v4348_v22  ;;  %2039 = vmatpush1.bf16.msra.mxu1 %v4350_v25 }
 0x3ce   : > { %1999 = vmatprep.subr.bf16.mxu0 %v4356_v8  ;;  %2040 = vmatprep.subr.bf16.mxu1 %v4358_v15 }
 0x3d1   : > { %2000 = vmatpush1.bf16.msra.mxu0 %v4360_v31  ;;  %2041 = vmatpush1.bf16.msra.mxu1 %v4362_v10 }
 0x3d2   : > { %2001 = vmatprep.subr.bf16.mxu0 %v4364_v18  ;;  %2042 = vmatprep.subr.bf16.mxu1 %v4366_v9 }
 0x3d5   : > { %2002 = vmatpush1.bf16.msra.mxu0 %v4372_v37  ;;  %2043 = vmatpush1.bf16.msra.mxu1 %v4374_v30 }
 0x3d6   : > { %2165 = vmatprep.subr.bf16.mxu0 %v4284_v53  ;;  %2206 = vmatprep.subr.bf16.mxu1 %v4286_v54 }
 0x457   : > { %v1413_v26 = vpop.f32.mrf.mxu0  ;;  %v1454_v12 = vpop.f32.mrf.mxu1 }
 0x458   : > { %v1461_v28 = vadd.f32 %v1413_v26, %v4143_v23  ;;  %v1463_v46 = vadd.f32 %v1454_v12, %v4673_v45 }
 0x459   : > { %v1415_v11 = vpop.f32.mrf.mxu0  ;;  %v1456_v14 = vpop.f32.mrf.mxu1 }
 0x45a   : > { %v1465_v7 = vadd.f32 %v1461_v28, %v4153_v29  ;;  %v1462_v36 = vadd.f32 %v1415_v11, %v4672_v34  ;;  %v1467_v23 = vadd.f32 %v1463_v46, %v4164_v27  ;;  %v1464_v49 = vadd.f32 %v1456_v14, %v4674_v48 }
 0x45b   : > { %v1417_v38 = vpop.f32.mrf.mxu0  ;;  %v1458_v39 = vpop.f32.mrf.mxu1 }
 0x45c   : > { %v2913_v40 = vmul.f32 -1.442695, %v1465_v7  ;;  %v1466_v41 = vadd.f32 %v1462_v36, %v4157_v33  ;;  %v2915_v50 = vmul.f32 -1.442695, %v1467_v23  ;;  %v1468_v51 = vadd.f32 %v1464_v49, %v4170_v47 }
 0x45d   : > { %v1418_v42 = vpop.f32.mrf.mxu0  ;;  %v1459_v43 = vpop.f32.mrf.mxu1 }
 0x45e   : > { %3348 = vpow2.f32 %v2913_v40  ;;  %v2914_v44 = vmul.f32 -1.442695, %v1466_v41  ;;  %v1817_v41 = vld [vmem:[#allocation6] sm:$0xff] }
 0x45f   : > { %v1826_v42 = vpack.c.bf16 %v1817_v41, %v1817_v41 }
 0x460   : > { %3350 = vpow2.f32 %v2914_v44 }
 0x461   : > { %3352 = vpow2.f32 %v2915_v50 }
 0x46b   : > { %v3349_v29 = vpop.eup %3348 }
 0x46c   : > { %v1478_v52 = vadd.f32 1.0, %v3349_v29 }
 0x46d   : > { %v3351_v26 = vpop.eup %3350 }
 0x46e   : > { %3354 = vrcp.f32 %v1478_v52  ;;  %v1479_v33 = vadd.f32 1.0, %v3351_v26  ;;  %v3353_v28 = vpop.eup %3352 }
 0x46f   : > { %3356 = vtanh.f32 %v1468_v51  ;;  %v1480_v12 = vadd.f32 1.0, %v3353_v28 }
 0x470   : > { %3358 = vrcp.f32 %v1479_v33  ;;  %v494_v33 = vld [vmem:[#allocation16] sm:$0xf] }
 0x471   : > { %3360 = vrcp.f32 %v1480_v12 }
 0x47b   : > { %v3355_v11 = vpop.eup %3354 }
 0x47c   : > { %v3357_v7 = vpop.eup %3356 }
 0x47d   : > { %v3359_v34 = vpop.eup %3358  ;;  %v1489_v36 = vmul.f32 %v3357_v7, %v3355_v11  ;;  %v4681_v7 = vsub.s32 0, %v4139_v21 }
 0x47e   : > { %v1488_v27 = vmul.f32 %v3359_v34, %v4271_v19  ;;  %v3361_v47 = vpop.eup %3360  ;;  %v1729_v19 = vpop.f32.mrf.mxu0 }
 0x47f   : > { %v4454_v34 = vrot.slane %v494_v33, %v4681_v7 }
 0x480   : > { %v1490_v14 = vadd.f32 %v1489_v36, %v1488_v27  ;;  %v1731_v43 = vpop.f32.mrf.mxu0 }
 0x482   : > { %1496 = vst [vmem:[#allocation5] sm:$0xff] %v1490_v14  ;;  %3362 = vtanh.f32 %v1490_v14  ;;  %v4428_v45 = vpop.f32.mrf.mxu0  ;;  %v4682_v14 = vsub.s32 1, %v4139_v21 }
 0x484   : > { %v4432_v23 = vpop.f32.mrf.mxu0 }
 0x48f   : > { %v3363_v38 = vpop.eup %3362 }
 0x490   : > { %v1492_v39 = vmul.f32 %v3363_v38, %v3361_v47  ;;  %v4458_v47 = vrot.slane %v494_v33, %v4682_v14 }
 0x492   : > { %1495 = vst [vmem:[#allocation4] sm:$0xff] %v1492_v39  ;;  %v1502_v40 = vpack.c.bf16 %v1492_v39, %v4274_v13  ;;  %v1782_v13 = vpop.f32.mrf.mxu1 }
 0x494   : > { %1738 = vmatmul.mubr.bf16.gmra.mxu0 %v1502_v40  ;;  %1791 = vmatmul.mubr.bf16.gmra.mxu1 %v1502_v40  ;;  %v1784_v44 = vpop.f32.mrf.mxu1 }
 0x495   : > { %2019 = vmatprep.mubr.bf16.mxu0 %v4671_v4  ;;  %2060 = vmatprep.mubr.bf16.mxu1 %v4671_v4 }
 0x496   : > { %v4430_v46 = vpop.f32.mrf.mxu1 }
 0x498   : > { %v4434_v48 = vpop.f32.mrf.mxu1 }
 0x49c   : > { %2020 = vmatmul.mubr.bf16.vlgmr.msra.gmra.mxu0 %v1826_v42  ;;  %2061 = vmatmul.mubr.bf16.vlgmr.msra.gmra.mxu1 %v1826_v42 }
 0x49d   : > { %2166 = vmatpush1.bf16.msra.mxu0 %v4288_v55  ;;  %2207 = vmatpush1.bf16.msra.mxu1 %v4290_v56 }
 0x49e   : > { %2167 = vmatprep.subr.bf16.mxu0 %v4296_v6  ;;  %2208 = vmatprep.subr.bf16.mxu1 %v4298_v35 }
 0x49f   : > { %2197 = vmatprep.mubr.bf16.mxu0 %v4671_v4  ;;  %2238 = vmatprep.mubr.bf16.mxu1 %v4671_v4 }
 0x4a1   : > { %2168 = vmatpush1.bf16.msra.mxu0 %v4300_v57  ;;  %2209 = vmatpush1.bf16.msra.mxu1 %v4302_v58 }
 0x4a2   : > { %2169 = vmatprep.subr.bf16.mxu0 %v4304_v59  ;;  %2210 = vmatprep.subr.bf16.mxu1 %v4308_v60 }
 0x4a5   : > { %2170 = vmatpush1.bf16.msra.mxu0 %v4312_v61  ;;  %2211 = vmatpush1.bf16.msra.mxu1 %v4314_v62 }
 0x4a6   : > { %2171 = vmatprep.subr.bf16.mxu0 %v4318_v63  ;;  %2212 = vmatprep.subr.bf16.mxu1 %v4320_v0 }
 0x4a9   : > { %2172 = vmatpush1.bf16.msra.mxu0 %v4324_v1  ;;  %2213 = vmatpush1.bf16.msra.mxu1 %v4326_v2 }
 0x4aa   : > { %2173 = vmatprep.subr.bf16.mxu0 %v4330_v3  ;;  %2214 = vmatprep.subr.bf16.mxu1 %v4332_v5 }
 0x4ad   : > { %2174 = vmatpush1.bf16.msra.mxu0 %v4336_v16  ;;  %2215 = vmatpush1.bf16.msra.mxu1 %v4338_v17 }
 0x4ae   : > { %2175 = vmatprep.subr.bf16.mxu0 %v4342_v20  ;;  %2216 = vmatprep.subr.bf16.mxu1 %v4344_v32 }
 0x4b1   : > { %2176 = vmatpush1.bf16.msra.mxu0 %v4348_v22  ;;  %2217 = vmatpush1.bf16.msra.mxu1 %v4350_v25 }
 0x4b2   : > { %2177 = vmatprep.subr.bf16.mxu0 %v4356_v8  ;;  %2218 = vmatprep.subr.bf16.mxu1 %v4358_v15 }
 0x4b5   : > { %2178 = vmatpush1.bf16.msra.mxu0 %v4360_v31  ;;  %2219 = vmatpush1.bf16.msra.mxu1 %v4362_v10 }
 0x4b6   : > { %2179 = vmatprep.subr.bf16.mxu0 %v4364_v18  ;;  %2220 = vmatprep.subr.bf16.mxu1 %v4366_v9 }
 0x4b9   : > { %2180 = vmatpush1.bf16.msra.mxu0 %v4372_v37  ;;  %2221 = vmatpush1.bf16.msra.mxu1 %v4374_v30 }
 0x4ba   : > { %2316 = vmatprep.subr.bf16.mxu0 %v4284_v53  ;;  %2357 = vmatprep.subr.bf16.mxu1 %v4286_v54 }
 0x554   : > { %v4436_v49 = vpop.f32.mrf.mxu0  ;;  %v4438_v50 = vpop.f32.mrf.mxu1 }
 0x555   : > { %4675 = vst [vmem:[#allocation24_spill] sm:$0xff] %v4438_v50 }
 0x556   : > { %v4440_v29 = vpop.f32.mrf.mxu0  ;;  %v4442_v51 = vpop.f32.mrf.mxu1 }
 0x557   : > { %4676 = vst [vmem:[#allocation22_spill] sm:$0xff] %v4442_v51 }
 0x558   : > { %v4444_v52 = vpop.f32.mrf.mxu0  ;;  %v4446_v26 = vpop.f32.mrf.mxu1 }
 0x559   : > { %4677 = vst [vmem:[#allocation23_spill] sm:$0xff] %v4444_v52  ;;  %4678 = vst [vmem:[#allocation25_spill] sm:$0xff] %v4446_v26 }
 0x55a   : > { %v4448_v28 = vpop.f32.mrf.mxu0  ;;  %v4450_v11 = vpop.f32.mrf.mxu1 }
 0x55b   : > { %4679 = vst [vmem:[#allocation26_spill] sm:$0xff] %v4448_v28  ;;  %4680 = vst [vmem:[#allocation27_spill] sm:$0xff] %v4450_v11 }
 0x55c   : > { %v2021_v12 = vpop.f32.mrf.mxu0  ;;  %v2062_v27 = vpop.f32.mrf.mxu1 }
 0x55d   : > { %v2069_v36 = vadd.f32 %v2021_v12, %v1729_v19  ;;  %v2071_v19 = vadd.f32 %v2062_v27, %v1782_v13  ;;  %v4683_v12 = vsub.s32 2, %v4139_v21  ;;  %v1818_v27 = vld [vmem:[#allocation7] sm:$0xff] }
 0x55e   : > { %v2023_v38 = vpop.f32.mrf.mxu0  ;;  %v2064_v39 = vpop.f32.mrf.mxu1 }
 0x55f   : > { %v2094_v40 = vadd.f32 %v4454_v34, %v2069_v36  ;;  %v2070_v41 = vadd.f32 %v2023_v38, %v1731_v43  ;;  %v4464_v14 = vrot.slane %v494_v33, %v4683_v12  ;;  %v2072_v50 = vadd.f32 %v2064_v39, %v1784_v44 }
 0x560   : > { %v2025_v42 = vpop.f32.mrf.mxu0  ;;  %v2066_v24 = vpop.f32.mrf.mxu1  ;;  %v4684_v43 = vsub.s32 3, %v4139_v21 }
 0x561   : > { %v2980_v26 = vmul.f32 -1.442695, %v2094_v40  ;;  %v2095_v11 = vadd.f32 %v4458_v47, %v2070_v41  ;;  %v2096_v51 = vadd.f32 %v4464_v14, %v2071_v19 }
 0x562   : > { %v2026_v28 = vpop.f32.mrf.mxu0  ;;  %v2067_v7 = vpop.f32.mrf.mxu1  ;;  %v4469_v36 = vrot.slane %v494_v33, %v4684_v43 }
 0x563   : > { %3364 = vpow2.f32 %v2980_v26  ;;  %v2981_v52 = vmul.f32 -1.442695, %v2095_v11  ;;  %v2982_v24 = vmul.f32 -1.442695, %v2096_v51  ;;  %v4478_v7 = vld [vmem:[%s4654_s7] ss:$0 sm:$0xff] }
 0x564   : > { %v2097_v28 = vadd.f32 %v4469_v36, %v2072_v50 }
 0x565   : > { %3366 = vpow2.f32 %v2981_v52 }
 0x566   : > { %3368 = vpow2.f32 %v2982_v24 }
 0x570   : > { %v3365_v38 = vpop.eup %3364 }
 0x571   : > { %v2107_v40 = vadd.f32 1.0, %v3365_v38 }
 0x572   : > { %v3367_v26 = vpop.eup %3366 }
 0x573   : > { %3370 = vrcp.f32 %v2107_v40  ;;  %v2108_v13 = vadd.f32 1.0, %v3367_v26  ;;  %v3369_v52 = vpop.eup %3368 }
 0x574   : > { %3372 = vtanh.f32 %v2097_v28  ;;  %v2109_v39 = vadd.f32 1.0, %v3369_v52 }
 0x575   : > { %3374 = vrcp.f32 %v2108_v13 }
 0x576   : > { %3376 = vrcp.f32 %v2109_v39 }
 0x580   : > { %v3371_v11 = vpop.eup %3370 }
 0x581   : > { %v3373_v41 = vpop.eup %3372 }
 0x582   : > { %v3375_v44 = vpop.eup %3374  ;;  %v2118_v33 = vmul.f32 %v3373_v41, %v3371_v11 }
 0x583   : > { %v2117_v21 = vmul.f32 %v3375_v44, %v1818_v27  ;;  %v3377_v50 = vpop.eup %3376 }
 0x585   : > { %v4472_v42 = vadd.f32 %v2118_v33, %v2117_v21 }
 0x587   : > { %3378 = vtanh.f32 %v4472_v42 }
 0x594   : > { %v3379_v51 = vpop.eup %3378 }
 0x595   : > { %v4480_v19 = vmul.f32 %v3379_v51, %v3377_v50 }
 0x597   : > { %v2164_v12 = vpack.c.bf16 %v4480_v19, %v4480_v19  ;;  %v2128_v43 = vmul.f32 %v4478_v7, %v4480_v19 }
 0x599   : > { %2198 = vmatmul.mubr.bf16.vlgmr.msra.gmra.mxu0 %v2164_v12  ;;  %2239 = vmatmul.mubr.bf16.vlgmr.msra.gmra.mxu1 %v2164_v12 }
 0x59a   : > { %2129 = vadd.xlane.f32.xlu0 %v2128_v43  ;;  %2317 = vmatpush1.bf16.msra.mxu0 %v4288_v55 }
 0x59b   : > { %2358 = vmatpush1.bf16.msra.mxu1 %v4290_v56  ;;  %2318 = vmatprep.subr.bf16.mxu0 %v4296_v6 }
 0x59c   : > { %2359 = vmatprep.subr.bf16.mxu1 %v4298_v35  ;;  %2348 = vmatprep.mubr.bf16.mxu0 %v4671_v4 }
 0x59d   : > { %2389 = vmatprep.mubr.bf16.mxu1 %v4671_v4 }
 0x59e   : > { %2319 = vmatpush1.bf16.msra.mxu0 %v4300_v57 }
 0x59f   : > { %2360 = vmatpush1.bf16.msra.mxu1 %v4302_v58  ;;  %2320 = vmatprep.subr.bf16.mxu0 %v4304_v59 }
 0x5a0   : > { %2361 = vmatprep.subr.bf16.mxu1 %v4308_v60 }
 0x5a2   : > { %2321 = vmatpush1.bf16.msra.mxu0 %v4312_v61 }
 0x5a3   : > { %2362 = vmatpush1.bf16.msra.mxu1 %v4314_v62  ;;  %2322 = vmatprep.subr.bf16.mxu0 %v4318_v63 }
 0x5a4   : > { %2363 = vmatprep.subr.bf16.mxu1 %v4320_v0 }
 0x5a6   : > { %2323 = vmatpush1.bf16.msra.mxu0 %v4324_v1 }
 0x5a7   : > { %2364 = vmatpush1.bf16.msra.mxu1 %v4326_v2  ;;  %2324 = vmatprep.subr.bf16.mxu0 %v4330_v3 }
 0x5a8   : > { %2365 = vmatprep.subr.bf16.mxu1 %v4332_v5 }
 0x5aa   : > { %2325 = vmatpush1.bf16.msra.mxu0 %v4336_v16 }
 0x5ab   : > { %2366 = vmatpush1.bf16.msra.mxu1 %v4338_v17  ;;  %2326 = vmatprep.subr.bf16.mxu0 %v4342_v20 }
 0x5ac   : > { %2367 = vmatprep.subr.bf16.mxu1 %v4344_v32 }
 0x5ae   : > { %2327 = vmatpush1.bf16.msra.mxu0 %v4348_v22 }
 0x5af   : > { %2368 = vmatpush1.bf16.msra.mxu1 %v4350_v25  ;;  %2328 = vmatprep.subr.bf16.mxu0 %v4356_v8 }
 0x5b0   : > { %2369 = vmatprep.subr.bf16.mxu1 %v4358_v15 }
 0x5b2   : > { %2329 = vmatpush1.bf16.msra.mxu0 %v4360_v31 }
 0x5b3   : > { %2370 = vmatpush1.bf16.msra.mxu1 %v4362_v10  ;;  %2330 = vmatprep.subr.bf16.mxu0 %v4364_v18 }
 0x5b4   : > { %2371 = vmatprep.subr.bf16.mxu1 %v4366_v9 }
 0x5b6   : > { %2331 = vmatpush1.bf16.msra.mxu0 %v4372_v37 }
 0x5b7   : > { %2372 = vmatpush1.bf16.msra.mxu1 %v4374_v30  ;;  %2467 = vmatprep.subr.bf16.mxu0 %v4284_v53 }
 0x5b8   : > { %2508 = vmatprep.subr.bf16.mxu1 %v4286_v54 }
 0x659   : > { %v2199_v24 = vpop.f32.mrf.mxu0  ;;  %v2240_v38 = vpop.f32.mrf.mxu1 }
 0x65a   : > { %v2247_v28 = vadd.f32 %v2199_v24, %v4428_v45  ;;  %v2249_v54 = vadd.f32 %v2240_v38, %v4430_v46 }
 0x65b   : > { %v2201_v40 = vpop.f32.mrf.mxu0  ;;  %v2242_v26 = vpop.f32.mrf.mxu1 }
 0x65c   : > { %v2251_v13 = vadd.f32 %v2247_v28, %v4454_v34  ;;  %v2248_v52 = vadd.f32 %v2201_v40, %v4432_v23  ;;  %v2253_v45 = vadd.f32 %v2249_v54, %v4464_v14  ;;  %v2250_v33 = vadd.f32 %v2242_v26, %v4434_v48 }
 0x65d   : > { %v2203_v11 = vpop.f32.mrf.mxu0  ;;  %v2244_v27 = vpop.f32.mrf.mxu1 }
 0x65e   : > { %v2985_v41 = vmul.f32 -1.442695, %v2251_v13  ;;  %v2252_v44 = vadd.f32 %v2248_v52, %v4458_v47  ;;  %v2987_v50 = vmul.f32 -1.442695, %v2253_v45  ;;  %v2254_v23 = vadd.f32 %v2250_v33, %v4469_v36  ;;  %v1819_v11 = vld [vmem:[#allocation8] sm:$0xff]  ;;  %v4533_v27 = vpop.xlane.xlu0 %2129 }
 0x65f   : > { %v2204_v39 = vpop.f32.mrf.mxu0  ;;  %v2245_v21 = vpop.f32.mrf.mxu1 }
 0x660   : > { %3380 = vpow2.f32 %v2985_v41  ;;  %v2986_v53 = vmul.f32 -1.442695, %v2252_v44  ;;  %v2135_v41 = vstv %s2134_s27  ;;  %v2133_v39 = vmax.f32 %v1819_v11, %v4533_v27 }
 0x661   : > { %vm4536_vm1 = vcmp.eq.s32.totalorder %v2135_v41, 1  ;;  %v4690_v41 = vld [vmem:[#allocation26_spill] sm:$0xff] }
 0x662   : > { %3382 = vpow2.f32 %v2986_v53  ;;  %v4544_v54 = vsel %vm4536_vm1, %v2133_v39, %v1819_v11 }
 0x663   : > { %3384 = vpow2.f32 %v2987_v50  ;;  %v2142_v50 = vsub.f32 %v1819_v11, %v4544_v54 }
 0x66d   : > { %v3381_v51 = vpop.eup %3380 }
 0x66e   : > { %v2264_v12 = vadd.f32 1.0, %v3381_v51  ;;  %v2143_v51 = vmul.f32 1.442695, %v2142_v50 }
 0x66f   : > { %v3383_v43 = vpop.eup %3382 }
 0x670   : > { %3386 = vrcp.f32 %v2264_v12  ;;  %v2265_v24 = vadd.f32 1.0, %v3383_v43  ;;  %v3385_v28 = vpop.eup %3384 }
 0x671   : > { %3388 = vtanh.f32 %v2254_v23  ;;  %v2266_v38 = vadd.f32 1.0, %v3385_v28 }
 0x672   : > { %3390 = vrcp.f32 %v2265_v24 }
 0x673   : > { %3392 = vrcp.f32 %v2266_v38  ;;  %v4689_v38 = vld [vmem:[#allocation23_spill] sm:$0xff] }
 0x67d   : > { %v3387_v40 = vpop.eup %3386 }
 0x67e   : > { %v3389_v13 = vpop.eup %3388 }
 0x67f   : > { %v3391_v46 = vpop.eup %3390  ;;  %v2275_v48 = vmul.f32 %v3389_v13, %v3387_v40 }
 0x680   : > { %v2274_v52 = vmul.f32 %v3391_v46, %v4472_v42  ;;  %v3393_v44 = vpop.eup %3392 }
 0x682   : > { %v4529_v26 = vadd.f32 %v2275_v48, %v2274_v52 }
 0x684   : > { %3394 = vtanh.f32 %v4529_v26 }
 0x685   : > { %3396 = vpow2.f32 %v2143_v51 }
 0x691   : > { %v3395_v21 = vpop.eup %3394 }
 0x692   : > { %v4540_v42 = vmul.f32 %v3395_v21, %v3393_v44 }
 0x694   : > { %v2315_v45 = vpack.c.bf16 %v4540_v42, %v4540_v42  ;;  %v2279_v33 = vmul.f32 %v4478_v7, %v4540_v42 }
 0x696   : > { %2349 = vmatmul.mubr.bf16.vlgmr.msra.gmra.mxu0 %v2315_v45  ;;  %2390 = vmatmul.mubr.bf16.vlgmr.msra.gmra.mxu1 %v2315_v45 }
 0x697   : > { %2280 = vadd.xlane.f32.xlu0 %v2279_v33  ;;  %2468 = vmatpush1.bf16.msra.mxu0 %v4288_v55 }
 0x698   : > { %2509 = vmatpush1.bf16.msra.mxu1 %v4290_v56  ;;  %2469 = vmatprep.subr.bf16.mxu0 %v4296_v6 }
 0x699   : > { %2510 = vmatprep.subr.bf16.mxu1 %v4298_v35  ;;  %2499 = vmatprep.mubr.bf16.mxu0 %v4671_v4 }
 0x69a   : > { %2540 = vmatprep.mubr.bf16.mxu1 %v4671_v4  ;;  %v4574_v4 = vpop.eup %3396 }
 0x69b   : > { %2470 = vmatpush1.bf16.msra.mxu0 %v4300_v57 }
 0x69c   : > { %2511 = vmatpush1.bf16.msra.mxu1 %v4302_v58  ;;  %2471 = vmatprep.subr.bf16.mxu0 %v4304_v59 }
 0x69d   : > { %2512 = vmatprep.subr.bf16.mxu1 %v4308_v60 }
 0x69f   : > { %2472 = vmatpush1.bf16.msra.mxu0 %v4312_v61 }
 0x6a0   : > { %2513 = vmatpush1.bf16.msra.mxu1 %v4314_v62  ;;  %2473 = vmatprep.subr.bf16.mxu0 %v4318_v63 }
 0x6a1   : > { %2514 = vmatprep.subr.bf16.mxu1 %v4320_v0 }
 0x6a3   : > { %2474 = vmatpush1.bf16.msra.mxu0 %v4324_v1 }
 0x6a4   : > { %2515 = vmatpush1.bf16.msra.mxu1 %v4326_v2  ;;  %2475 = vmatprep.subr.bf16.mxu0 %v4330_v3  ;;  %v4687_v3 = vld [vmem:[#allocation24_spill] sm:$0xff] }
 0x6a5   : > { %2516 = vmatprep.subr.bf16.mxu1 %v4332_v5 }
 0x6a7   : > { %2476 = vmatpush1.bf16.msra.mxu0 %v4336_v16 }
 0x6a8   : > { %2517 = vmatpush1.bf16.msra.mxu1 %v4338_v17  ;;  %2477 = vmatprep.subr.bf16.mxu0 %v4342_v20  ;;  %v4688_v17 = vld [vmem:[#allocation22_spill] sm:$0xff] }
 0x6a9   : > { %2518 = vmatprep.subr.bf16.mxu1 %v4344_v32 }
 0x6ab   : > { %2478 = vmatpush1.bf16.msra.mxu0 %v4348_v22 }
 0x6ac   : > { %2519 = vmatpush1.bf16.msra.mxu1 %v4350_v25  ;;  %2479 = vmatprep.subr.bf16.mxu0 %v4356_v8 }
 0x6ad   : > { %2149 = vperm.xlu0 %3104, %v4574_v4   ;;  %2520 = vmatprep.subr.bf16.mxu1 %v4358_v15 }
 0x6af   : > { %2480 = vmatpush1.bf16.msra.mxu0 %v4360_v31 }
 0x6b0   : > { %2521 = vmatpush1.bf16.msra.mxu1 %v4362_v10  ;;  %2481 = vmatprep.subr.bf16.mxu0 %v4364_v18 }
 0x6b1   : > { %2522 = vmatprep.subr.bf16.mxu1 %v4366_v9 }
 0x6b3   : > { %2482 = vmatpush1.bf16.msra.mxu0 %v4372_v37 }
 0x6b4   : > { %2523 = vmatpush1.bf16.msra.mxu1 %v4374_v30 }
 0x756   : > { %v2350_v55 = vpop.f32.mrf.mxu0  ;;  %v2391_v56 = vpop.f32.mrf.mxu1 }
 0x757   : > { %v2398_v6 = vadd.f32 %v2350_v55, %v4436_v49  ;;  %v2400_v5 = vadd.f32 %v2391_v56, %v4687_v3  ;;  %v4691_v56 = vld [vmem:[#allocation25_spill] sm:$0xff] }
 0x758   : > { %v2352_v35 = vpop.f32.mrf.mxu0  ;;  %v2393_v57 = vpop.f32.mrf.mxu1 }
 0x759   : > { %v2402_v58 = vadd.f32 %v2398_v6, %v4454_v34  ;;  %v2399_v59 = vadd.f32 %v2352_v35, %v4440_v29  ;;  %v2404_v16 = vadd.f32 %v2400_v5, %v4464_v14  ;;  %v2401_v20 = vadd.f32 %v2393_v57, %v4688_v17  ;;  %v4692_v57 = vld [vmem:[#allocation27_spill] sm:$0xff] }
 0x75a   : > { %v2354_v60 = vpop.f32.mrf.mxu0  ;;  %v2395_v61 = vpop.f32.mrf.mxu1  ;;  %v2286_v17 = vstv %s2285_s21 }
 0x75b   : > { %v2988_v62 = vmul.f32 -1.442695, %v2402_v58  ;;  %v2403_v63 = vadd.f32 %v2399_v59, %v4458_v47  ;;  %v2990_v32 = vmul.f32 -1.442695, %v2404_v16  ;;  %v2405_v25 = vadd.f32 %v2401_v20, %v4469_v36 }
 0x75c   : > { %v2355_v0 = vpop.f32.mrf.mxu0  ;;  %v2396_v1 = vpop.f32.mrf.mxu1  ;;  %v2138_v20 = vsub.f32 %v4533_v27, %v4544_v54  ;;  %vm2287_vm2 = vcmp.eq.s32.totalorder %v2286_v17, 1 }
 0x75d   : > { %3398 = vpow2.f32 %v2988_v62  ;;  %v2989_v2 = vmul.f32 -1.442695, %v2403_v63 }
 0x75f   : > { %3400 = vpow2.f32 %v2989_v2 }
 0x760   : > { %3402 = vpow2.f32 %v2990_v32 }
 0x76a   : > { %v3399_v22 = vpop.eup %3398 }
 0x76b   : > { %v2415_v8 = vadd.f32 1.0, %v3399_v22 }
 0x76c   : > { %v3401_v15 = vpop.eup %3400 }
 0x76d   : > { %3404 = vrcp.f32 %v2415_v8  ;;  %v2416_v31 = vadd.f32 1.0, %v3401_v15  ;;  %v3403_v10 = vpop.eup %3402  ;;  %v2139_v8 = vmul.f32 1.442695, %v2138_v20 }
 0x76e   : > { %3406 = vtanh.f32 %v2405_v25  ;;  %v2417_v30 = vadd.f32 1.0, %v3403_v10 }
 0x76f   : > { %3408 = vrcp.f32 %v2416_v31 }
 0x770   : > { %3410 = vrcp.f32 %v2417_v30 }
 0x77a   : > { %v3405_v18 = vpop.eup %3404 }
 0x77b   : > { %v3407_v9 = vpop.eup %3406 }
 0x77c   : > { %v3409_v37 = vpop.eup %3408  ;;  %v2426_v29 = vmul.f32 %v3407_v9, %v3405_v18  ;;  %v2437_v18 = vstv %s2436_s23 }
 0x77d   : > { %v2425_v49 = vmul.f32 %v3409_v37, %v4529_v26  ;;  %v3411_v12 = vpop.eup %3410  ;;  %vm2438_vm3 = vcmp.eq.s32.totalorder %v2437_v18, 1 }
 0x77f   : > { %v2427_v23 = vadd.f32 %v2426_v29, %v2425_v49 }
 0x781   : > { %3412 = vtanh.f32 %v2427_v23 }
 0x78e   : > { %v3413_v43 = vpop.eup %3412 }
 0x78f   : > { %v4595_v24 = vmul.f32 %v3413_v43, %v3411_v12 }
 0x791   : > { %v2466_v28 = vpack.c.bf16 %v4595_v24, %v4595_v24  ;;  %v2430_v40 = vmul.f32 %v4478_v7, %v4595_v24 }
 0x793   : > { %2500 = vmatmul.mubr.bf16.vlgmr.msra.gmra.mxu0 %v2466_v28  ;;  %2541 = vmatmul.mubr.bf16.vlgmr.msra.gmra.mxu1 %v2466_v28 }
 0x794   : > { %2431 = vadd.xlane.f32.xlu1 %v2430_v40 }
 0x81d   : > { %v2432_v10 = vpop.xlane.xlu1 %2431 }
 0x853   : > { %v2501_v13 = vpop.f32.mrf.mxu0  ;;  %v2542_v46 = vpop.f32.mrf.mxu1 }
 0x854   : > { %v2549_v52 = vadd.f32 %v2501_v13, %v4689_v38  ;;  %v2551_v6 = vadd.f32 %v2542_v46, %v4691_v56 }
 0x855   : > { %v2503_v48 = vpop.f32.mrf.mxu0  ;;  %v2544_v26 = vpop.f32.mrf.mxu1 }
 0x856   : > { %v2553_v11 = vadd.f32 %v2549_v52, %v4454_v34  ;;  %v2550_v44 = vadd.f32 %v2503_v48, %v4690_v41  ;;  %v2555_v35 = vadd.f32 %v2551_v6, %v4464_v14  ;;  %v2552_v58 = vadd.f32 %v2544_v26, %v4692_v57 }
 0x857   : > { %v2505_v39 = vpop.f32.mrf.mxu0  ;;  %v2546_v21 = vpop.f32.mrf.mxu1 }
 0x858   : > { %v2991_v45 = vmul.f32 -1.442695, %v2553_v11  ;;  %v2554_v33 = vadd.f32 %v2550_v44, %v4458_v47  ;;  %v2993_v59 = vmul.f32 -1.442695, %v2555_v35  ;;  %v2556_v60 = vadd.f32 %v2552_v58, %v4469_v36  ;;  %v2281_v36 = vpop.xlane.xlu0 %2280  ;;  %v1820_v44 = vld [vmem:[#allocation9] sm:$0xff] }
 0x859   : > { %v2506_v50 = vpop.f32.mrf.mxu0  ;;  %v2547_v51 = vpop.f32.mrf.mxu1  ;;  %v2284_v32 = vmax.f32 %v4544_v54, %v2281_v36  ;;  %v2588_v11 = vstv %s2587_s22 }
 0x85a   : > { %3414 = vpow2.f32 %v2991_v45  ;;  %v2992_v55 = vmul.f32 -1.442695, %v2554_v33  ;;  %vm2589_vm4 = vcmp.eq.s32.totalorder %v2588_v11, 1  ;;  %v2145_v33 = vmul.f32 %v4574_v4, %v1820_v44 }
 0x85b   : > { %v2288_v15 = vsel %vm2287_vm2, %v2284_v32, %v4544_v54 }
 0x85c   : > { %3416 = vpow2.f32 %v2992_v55  ;;  %v2293_v27 = vsub.f32 %v4544_v54, %v2288_v15  ;;  %v2289_v37 = vsub.f32 %v2281_v36, %v2288_v15  ;;  %v2435_v30 = vmax.f32 %v2288_v15, %v2432_v10 }
 0x85d   : > { %3418 = vpow2.f32 %v2993_v59 }
 0x85e   : > { %v2294_v49 = vmul.f32 1.442695, %v2293_v27  ;;  %v2290_v29 = vmul.f32 1.442695, %v2289_v37 }
 0x867   : > { %v3415_v34 = vpop.eup %3414 }
 0x868   : > { %v2566_v61 = vadd.f32 1.0, %v3415_v34 }
 0x869   : > { %v3417_v62 = vpop.eup %3416 }
 0x86a   : > { %3420 = vrcp.f32 %v2566_v61  ;;  %v2567_v47 = vadd.f32 1.0, %v3417_v62  ;;  %v3419_v63 = vpop.eup %3418 }
 0x86b   : > { %3422 = vtanh.f32 %v2556_v60  ;;  %v2568_v14 = vadd.f32 1.0, %v3419_v63  ;;  %v1821_v63 = vld [vmem:[#allocation10] sm:$0xff] }
 0x86c   : > { %3424 = vrcp.f32 %v2567_v47 }
 0x86d   : > { %3426 = vrcp.f32 %v2568_v14 }
 0x877   : > { %v3421_v0 = vpop.eup %3420 }
 0x878   : > { %v3423_v1 = vpop.eup %3422 }
 0x879   : > { %v3425_v2 = vpop.eup %3424  ;;  %v2577_v5 = vmul.f32 %v3423_v1, %v3421_v0  ;;  %v2150_v0 = vpop.permute.xlu0 %2149 }
 0x87a   : > { %v2576_v3 = vmul.f32 %v3425_v2, %v2427_v23  ;;  %v3427_v22 = vpop.eup %3426  ;;  %v2439_v23 = vsel %vm2438_vm3, %v2435_v30, %v2288_v15  ;;  %v2152_v2 = vmul.f32 %v2150_v0, %v1821_v63 }
 0x87b   : > { %v2444_v12 = vsub.f32 %v2288_v15, %v2439_v23  ;;  %v2440_v43 = vsub.f32 %v2432_v10, %v2439_v23 }
 0x87c   : > { %v2578_v16 = vadd.f32 %v2577_v5, %v2576_v3 }
 0x87d   : > { %v2445_v28 = vmul.f32 1.442695, %v2444_v12  ;;  %v2441_v40 = vmul.f32 1.442695, %v2440_v43 }
 0x87e   : > { %2614 = vst [vmem:[#allocation7] sm:$0xff] %v2578_v16  ;;  %3428 = vtanh.f32 %v2578_v16 }
 0x87f   : > { %3430 = vpow2.f32 %v2139_v8 }
 0x880   : > { %3432 = vpow2.f32 %v2294_v49 }
 0x881   : > { %3434 = vpow2.f32 %v2290_v29 }
 0x882   : > { %3436 = vpow2.f32 %v2445_v28 }
 0x883   : > { %3438 = vpow2.f32 %v2441_v40 }
 0x88b   : > { %v3429_v25 = vpop.eup %3428 }
 0x88c   : > { %v4616_v31 = vmul.f32 %v3429_v25, %v3427_v22 }
 0x88e   : > { %v2581_v9 = vmul.f32 %v4478_v7, %v4616_v31  ;;  %2613 = vst [vmem:[#allocation6] sm:$0xff] %v4616_v31  ;;  %v3431_v7 = vpop.eup %3430 }
 0x88f   : > { %v2141_v54 = vsel %vm4536_vm1, %v3431_v7, 0.0  ;;  %v3433_v13 = vpop.eup %3432 }
 0x890   : > { %2582 = vadd.xlane.f32.xlu1 %v2581_v9  ;;  %v3435_v46 = vpop.eup %3434  ;;  %v2146_v55 = vadd.f32 %v2145_v33, %v2141_v54 }
 0x891   : > { %v2292_v38 = vsel %vm2287_vm2, %v3435_v46, 0.0  ;;  %v3437_v52 = vpop.eup %3436 }
 0x892   : > { %v3439_v48 = vpop.eup %3438  ;;  %v2296_v56 = vmul.f32 %v3433_v13, %v2146_v55 }
 0x893   : > { %v2443_v26 = vsel %vm2438_vm3, %v3439_v48, 0.0 }
 0x894   : > { %v2297_v6 = vadd.f32 %v2296_v56, %v2292_v38 }
 0x896   : > { %v2447_v35 = vmul.f32 %v3437_v52, %v2297_v6 }
 0x898   : > { %v2448_v58 = vadd.f32 %v2447_v35, %v2443_v26 }
 0x8a1   : > { %2155 = vperm.xlu1 %3105, %v2141_v54  }
 0x8a5   : > { %2300 = vperm.xlu1 %3105, %v3433_v13  }
 0x8a9   : > { %2306 = vperm.xlu1 %3105, %v2292_v38  }
 0x8ad   : > { %2451 = vperm.xlu1 %3105, %v3437_v52  }
 0x8b1   : > { %2457 = vperm.xlu1 %3105, %v2443_v26  }
 0x919   : > { %v2583_v53 = vpop.xlane.xlu1 %2582 }
 0x91a   : > { %v2586_v41 = vmax.f32 %v2439_v23, %v2583_v53 }
 0x91c   : > { %v2590_v39 = vsel %vm2589_vm4, %v2586_v41, %v2439_v23 }
 0x91d   : > { %v2591_v21 = vsub.f32 %v2583_v53, %v2590_v39  ;;  %v2595_v45 = vsub.f32 %v2439_v23, %v2590_v39  ;;  %2616 = vst.msk [vmem:[#allocation8] sm:$0xff] %vm2615_vm5, %v2590_v39  ;;  %v2156_v4 = vpop.permute.xlu1 %2155 }
 0x91e   : > { %v2158_v1 = vmul.f32 %v2156_v4, %v4480_v19 }
 0x91f   : > { %v2592_v50 = vmul.f32 1.442695, %v2591_v21  ;;  %v2596_v51 = vmul.f32 1.442695, %v2595_v45 }
 0x920   : > { %v2159_v3 = vadd.f32 %v2158_v1, %v2152_v2 }
 0x921   : > { %3440 = vpow2.f32 %v2592_v50  ;;  %v2301_v62 = vpop.permute.xlu1 %2300 }
 0x922   : > { %3442 = vpow2.f32 %v2596_v51  ;;  %v2303_v16 = vmul.f32 %v2301_v62, %v2159_v3 }
 0x925   : > { %v2307_v47 = vpop.permute.xlu1 %2306 }
 0x926   : > { %v2309_v5 = vmul.f32 %v2307_v47, %v4540_v42 }
 0x928   : > { %v2310_v17 = vadd.f32 %v2309_v5, %v2303_v16 }
 0x929   : > { %v2452_v14 = vpop.permute.xlu1 %2451 }
 0x92a   : > { %v2454_v22 = vmul.f32 %v2452_v14, %v2310_v17 }
 0x92d   : > { %v2458_v36 = vpop.permute.xlu1 %2457 }
 0x92e   : > { %v3441_v57 = vpop.eup %3440  ;;  %v2460_v20 = vmul.f32 %v2458_v36, %v4595_v24 }
 0x92f   : > { %v3443_v59 = vpop.eup %3442  ;;  %v2594_v34 = vsel %vm2589_vm4, %v3441_v57, 0.0 }
 0x930   : > { %2602 = vperm.xlu1 %3105, %v3443_v59   ;;  %v2598_v60 = vmul.f32 %v3443_v59, %v2448_v58  ;;  %v2461_v25 = vadd.f32 %v2460_v20, %v2454_v22 }
 0x932   : > { %v2599_v61 = vadd.f32 %v2598_v60, %v2594_v34 }
 0x934   : > { %2608 = vperm.xlu1 %3105, %v2594_v34   ;;  %2617 = vst.msk [vmem:[#allocation9] sm:$0xff] %vm2615_vm5, %v2599_v61 }
 0x9ab   : > { %v2603_v32 = vpop.permute.xlu1 %2602 }
 0x9ac   : > { %v2605_v15 = vmul.f32 %v2603_v32, %v2461_v25 }
 0x9af   : > { %v2609_v8 = vpop.permute.xlu1 %2608 }
 0x9b0   : > { %v2611_v10 = vmul.f32 %v2609_v8, %v4616_v31  ;;  %2622 = sbr.rel (%p2994_p1) target bundleno = 2828 (0xb0c), region = 88 }
 0x9b2   : > { %v2612_v18 = vadd.f32 %v2611_v10, %v2605_v15 }
 0x9b4   : > { %2618 = vst [vmem:[#allocation10] sm:$0xff] %v2612_v18 }
 0x9b5   : > { %v3617_v19 = vmov 0   ;;  %v3618_v42 = vmov 0.0   ;;  %v3445_v9 = vld [vmem:[#allocation18 + $0x38] sm:$0xff]   ;;  %v3446_v24 = vld [vmem:[#allocation18 + $0x30] sm:$0xff]   ;;  %v3447_v27 = vld [vmem:[#allocation18 + $0x28] sm:$0xff]   ;;  %vm3619_vm6 = vmmov 0  }
 0x9b6   : > { %3444 = vset.pattern.permute.xlu0 %v3617_v19  ;;  %3015 = vmatprep.subr.bf16.mxu0 %v3618_v42  ;;  %v3448_v37 = vld [vmem:[#allocation18 + $0x20] sm:$0xff]   ;;  %v3449_v31 = vld [vmem:[#allocation18 + $0x18] sm:$0xff]   ;;  %v3450_v30 = vld [vmem:[#allocation18 + $0x10] sm:$0xff]  }
 0x9b7   : > { %2625 = vperm.xlu0 %3444, %v2599_v61   ;;  %3016 = vmatpush3.bf16.msra.mxu0 %v3445_v9  ;;  %v3451_v49 = vld [vmem:[#allocation18 + $0x8] sm:$0xff]   ;;  %v3452_v29 = vld [vmem:[#allocation18] sm:$0xff]  }
 0x9b8   : > { %3017 = vmatprep.subr.bf16.mxu0 %v3618_v42  ;;  %3031 = vmatprep.mubr.msk.bf16.mxu0 %vm3619_vm6, %v3618_v42  ;;  %v2995_v40 = vld [vmem:[%s4656_s9] ss:$0 sm:$0xff] }
 0x9bb   : > { %3018 = vmatpush3.bf16.msra.mxu0 %v3446_v24 }
 0x9bc   : > { %3019 = vmatprep.subr.bf16.mxu0 %v3618_v42 }
 0x9bf   : > { %3020 = vmatpush3.bf16.msra.mxu0 %v3447_v27 }
 0x9c0   : > { %3021 = vmatprep.subr.bf16.mxu0 %v3618_v42 }
 0x9c3   : > { %3022 = vmatpush3.bf16.msra.mxu0 %v3448_v37 }
 0x9c4   : > { %3023 = vmatprep.subr.bf16.mxu0 %v3618_v42 }
 0x9c7   : > { %3024 = vmatpush3.bf16.msra.mxu0 %v3449_v31 }
 0x9c8   : > { %3025 = vmatprep.subr.bf16.mxu0 %v3618_v42 }
 0x9cb   : > { %3026 = vmatpush3.bf16.msra.mxu0 %v3450_v30 }
 0x9cc   : > { %3027 = vmatprep.subr.bf16.mxu0 %v3618_v42 }
 0x9cf   : > { %3028 = vmatpush3.bf16.msra.mxu0 %v3451_v49 }
 0x9d0   : > { %3029 = vmatprep.subr.bf16.mxu0 %v3618_v42 }
 0x9d3   : > { %3030 = vmatpush3.bf16.msra.mxu0 %v3452_v29 }
 0xa32   : > { %v2626_v23 = vpop.permute.xlu0 %2625 }
 0xa33   : > { %3453 = vrcp.f32 %v2626_v23 }
 0xa40   : > { %v3454_v12 = vpop.eup %3453 }
 0xa41   : > { %v2629_v43 = vmul.f32 %v3454_v12, %v2612_v18 }
 0xa43   : > { %v2630_v28 = vpack.c.bf16 %v2629_v43, %v2629_v43 }
 0xa45   : > { %3032 = vmatmul.mubr.bf16.vlgmr.msra.gmra.mxu0 %v2630_v28 }
 0xb05   : > { %v2736_v7 = vpop.f32.mrf.mxu0 }
 0xb06   : > { %v2737_v54 = vadd.f32 %v2995_v40, %v2736_v7 }
 0xb07   : > { %v3033_v13 = vpop.f32.mrf.mxu0 }
 0xb08   : > { %2742 = vst [vmem:[%s4657_s10] sm:$0xff] %v2737_v54 }
 0xb09   : > { %v2739_v46 = vpop.f32.mrf.mxu0 }
 0xb0b   : > { %v3034_v38 = vpop.f32.mrf.mxu0 }
 0xb0c PF: > { %s23_s13 = sadd.s32 1, %s3603_s13  }
 0xb0d   : > { %p20_p8 = scmp.ge.s32.totalorder %s23_s13, 5  }
 0xb0f   :  { %22 = sbr.rel (!%p20_p8) target bundleno = 3 (0x3), region = 121 }
 0xb14   :  { %2754 = vsyncpa [#allocation12], 1 }
 0xb15   :  { %2756 = vsyncpa [#allocation12 + $0x1], 1 }
 0xb16   :  { %2757 = vsyncpa [#allocation14], 1 }
 0xb17   :  { %2758 = vsyncpa [#allocation17], 1 }

</bundles_post_ra>
